<compile_context>
chip_gen: v7x
topology: tpu7x:2x2x1
jax: 0.10.0
libtpu: 0.0.40
codegen_flags: <defaults>
</compile_context>

<pallas_src>
import functools

import jax
import jax.numpy as jnp
from jax import lax
from jax.experimental import pallas as pl
from jax.experimental.pallas import tpu as pltpu


def _sigmoid_via_tanh(x):
    # sigmoid(x) == 0.5 * (tanh(x/2) + 1): one EUP op, no divide.
    return 0.5 * (jnp.tanh(0.5 * x) + 1.0)


def _make_gru_kernel(num_layers: int, B_pad: int, T: int, H: int):
    """Kernel ref layout:
       x(T*B_pad, in_0)                                   (time-major, batch-padded)
       per layer: w_ih_fused(in_l, 3H), w_hh_fused(H, 3H),
                  b_i_fused(1, 3H), b_h_fused(1, 3H)      (4 refs / layer)
       w_fc(H, O), b_fc(1, O)
       out(B_pad, O)
    """
    NL = num_layers
    G = 3 * H

    def kernel(*refs):
        x_ref = refs[0]
        layer_refs = refs[1:1 + 4 * NL]
        w_fc_ref = refs[1 + 4 * NL]
        b_fc_ref = refs[2 + 4 * NL]
        out_ref = refs[3 + 4 * NL]

        x_all = x_ref[...]                                   # (T*B_pad, in_0)
        h = jnp.zeros((B_pad, H), dtype=jnp.float32)

        for l in range(NL):
            wih, whh, bi, bh = layer_refs[4 * l:4 * l + 4]

            # ---- hoisted, fused input projection: ONE matmul per layer ----
            gi_all = (jnp.dot(x_all, wih[...],
                              preferred_element_type=jnp.float32) + bi[...])

            # ---- loop-invariant loads / broadcasts hoisted out of the loop ----
            Whh = whh[...]                                   # (H, 3H)
            bh_b = jnp.broadcast_to(bh[...], (B_pad, G))     # [0 | 0 | b_hn]

            h = jnp.zeros((B_pad, H), dtype=jnp.float32)
            outs = []
            last_layer = (l == NL - 1)

            # T small & static -> fully unrolled, sublane-aligned static slices.
            for t in range(T):
                gi = lax.slice(gi_all, (t * B_pad, 0), ((t + 1) * B_pad, G))
                # ONE fused hidden projection per step (single MXU round trip).
                gh = jnp.dot(h, Whh,
                             preferred_element_type=jnp.float32) + bh_b
                # One EUP call for both r and z (adjacent in the fused layout).
                rz = _sigmoid_via_tanh(gi[:, :2 * H] + gh[:, :2 * H])
                r = rz[:, :H]
                z = rz[:, H:]
                n = jnp.tanh(gi[:, 2 * H:] + r * gh[:, 2 * H:])
                h = n + z * (h - n)        # == (1-z)*n + z*h
                if not last_layer:
                    outs.append(h)

            if not last_layer:
                # Next layer's time-major input, materialized once per layer.
                x_all = jnp.concatenate(outs, axis=0)        # (T*B_pad, H)

        # ---- final Linear on the last timestep's hidden state ----
        out = jnp.dot(h, w_fc_ref[...],
                      preferred_element_type=jnp.float32) + b_fc_ref[...]
        out_ref[...] = out.astype(out_ref.dtype)

    return kernel


def init_gru_params(key, input_size, hidden_size, num_layers, output_size):
    """Deterministic PyTorch-style uniform init: U(-1/sqrt(H), 1/sqrt(H))."""
    params = {"layers": []}
    k = 1.0 / jnp.sqrt(hidden_size)
    for l in range(num_layers):
        in_sz = input_size if l == 0 else hidden_size
        key, k1, k2, k3, k4 = jax.random.split(key, 5)
        params["layers"].append({
            "w_ih": jax.random.uniform(k1, (3 * hidden_size, in_sz), jnp.float32, -k, k),
            "w_hh": jax.random.uniform(k2, (3 * hidden_size, hidden_size), jnp.float32, -k, k),
            "b_ih": jax.random.uniform(k3, (3 * hidden_size,), jnp.float32, -k, k),
            "b_hh": jax.random.uniform(k4, (3 * hidden_size,), jnp.float32, -k, k),
        })
    kf = 1.0 / jnp.sqrt(hidden_size)
    key, k1, k2 = jax.random.split(key, 3)
    params["w_fc"] = jax.random.uniform(k1, (output_size, hidden_size), jnp.float32, -kf, kf)
    params["b_fc"] = jax.random.uniform(k2, (output_size,), jnp.float32, -kf, kf)
    return params


@functools.partial(jax.jit, static_argnames=("hidden_size", "num_layers", "output_size"))
def gru_model_forward(x, params, *, hidden_size, num_layers, output_size):
    B, T, input_size = x.shape
    H = hidden_size
    O = output_size
    B_pad = ((B + 7) // 8) * 8          # pad batch to the f32 sublane tile

    # Time-major, batch-padded input as a lane/sublane-dense 2-D slab.
    xt = jnp.transpose(x.astype(jnp.float32), (1, 0, 2))         # (T, B, in)
    xt = jnp.pad(xt, ((0, 0), (0, B_pad - B), (0, 0)))           # (T, B_pad, in)
    xt = xt.reshape(T * B_pad, input_size)                       # (T*B_pad, in)

    # Fused, pre-transposed parameters (PyTorch gate order r, z, n is kept).
    flat = [xt]
    for l in range(num_layers):
        p = params["layers"][l]
        w_ih_t = jnp.transpose(p["w_ih"]).astype(jnp.float32)    # (in_l, 3H), cols [r|z|n]
        w_hh_t = jnp.transpose(p["w_hh"]).astype(jnp.float32)    # (H, 3H),   cols [r|z|n]
        bih, bhh = p["b_ih"], p["b_hh"]
        bi_fused = jnp.concatenate([bih[:H] + bhh[:H],
                                    bih[H:2 * H] + bhh[H:2 * H],
                                    bih[2 * H:]]).reshape(1, 3 * H)
        bh_fused = jnp.concatenate([jnp.zeros((2 * H,), jnp.float32),
                                    bhh[2 * H:]]).reshape(1, 3 * H)
        flat += [w_ih_t, w_hh_t, bi_fused, bh_fused]
    flat.append(jnp.transpose(params["w_fc"]).astype(jnp.float32))   # (H, O)
    flat.append(params["b_fc"].reshape(1, O).astype(jnp.float32))    # (1, O)

    kernel = _make_gru_kernel(num_layers, B_pad, T, H)

    # Explicit VMEM budget from the (small) resident set + value intermediates,
    # with headroom; capped at 64 MiB so it is valid on v7x as well.
    in_bytes = sum(int(a.size) * a.dtype.itemsize for a in flat)
    interm_bytes = (T * B_pad) * (3 * H + H) * 4 + B_pad * O * 4
    vmem_limit = int(min(max(2 * (in_bytes + interm_bytes) + (4 << 20), 16 << 20),
                         64 << 20))

    out = pl.pallas_call(
        kernel,
        out_shape=jax.ShapeDtypeStruct((B_pad, O), jnp.float32),
        in_specs=[pl.BlockSpec(memory_space=pltpu.MemorySpace.VMEM)] * len(flat),
        out_specs=pl.BlockSpec(memory_space=pltpu.MemorySpace.VMEM),
        compiler_params=pltpu.CompilerParams(vmem_limit_bytes=vmem_limit),
    )(*flat)
    return out[:B]


def gru_model_reference(x, params, *, hidden_size, num_layers, output_size):
    """Pure-JAX reference matching torch.nn.GRU(batch_first=True) + Linear."""
    B, T, _ = x.shape
    H = hidden_size
    seq = x.astype(jnp.float32)
    for l in range(num_layers):
        p = params["layers"][l]
        wih_t = jnp.transpose(p["w_ih"])
        whh_t = jnp.transpose(p["w_hh"])
        bih, bhh = p["b_ih"], p["b_hh"]
        h = jnp.zeros((B, H), jnp.float32)
        outs = []
        for t in range(T):
            gi = seq[:, t, :] @ wih_t + bih
            gh = h @ whh_t + bhh
            r = jax.nn.sigmoid(gi[:, :H] + gh[:, :H])
            z = jax.nn.sigmoid(gi[:, H:2 * H] + gh[:, H:2 * H])
            n = jnp.tanh(gi[:, 2 * H:] + r * gh[:, 2 * H:])
            h = (1.0 - z) * n + z * h
            outs.append(h)
        seq = jnp.stack(outs, axis=1)
    return seq[:, -1, :] @ jnp.transpose(params["w_fc"]) + params["b_fc"]


if __name__ == "__main__":
    B, T = 2, 8
    input_size, hidden_size, num_layers, output_size = 16, 32, 2, 8

    key = jax.random.PRNGKey(0)
    key, kx, kp = jax.random.split(key, 3)
    x = jax.random.normal(kx, (B, T, input_size), jnp.float32)
    params = init_gru_params(kp, input_size, hidden_size, num_layers, output_size)

    out = gru_model_forward(
        x, params,
        hidden_size=hidden_size, num_layers=num_layers, output_size=output_size,
    )
    out = jax.block_until_ready(out)

    ref = gru_model_reference(
        x, params,
        hidden_size=hidden_size, num_layers=num_layers, output_size=output_size,
    )
    assert out.shape == (B, output_size)
    assert jnp.allclose(out, ref, atol=1e-4, rtol=1e-4), "Pallas output mismatch vs reference"

    print("KERNEL_OK")
</pallas_src>

<mosaic_0001>
module attributes {stable_mosaic.version = 11 : i64} {
  func.func @kernel(%arg0: memref<64x16xf32, #tpu.memory_space<vmem>>, %arg1: memref<16x96xf32, #tpu.memory_space<vmem>>, %arg2: memref<32x96xf32, #tpu.memory_space<vmem>>, %arg3: memref<1x96xf32, #tpu.memory_space<vmem>>, %arg4: memref<1x96xf32, #tpu.memory_space<vmem>>, %arg5: memref<32x96xf32, #tpu.memory_space<vmem>>, %arg6: memref<32x96xf32, #tpu.memory_space<vmem>>, %arg7: memref<1x96xf32, #tpu.memory_space<vmem>>, %arg8: memref<1x96xf32, #tpu.memory_space<vmem>>, %arg9: memref<32x8xf32, #tpu.memory_space<vmem>>, %arg10: memref<1x8xf32, #tpu.memory_space<vmem>>, %arg11: memref<8x8xf32, #tpu.memory_space<vmem>>) attributes {dimension_semantics = [], scalar_prefetch = 0 : i64, scratch_operands = 0 : i64, tpu.core_type = #tpu.core_type<tc>} {
    %c0 = arith.constant 0 : index
    %c0_0 = arith.constant 0 : index
    %0 = vector.load %arg0[%c0, %c0_0] : memref<64x16xf32, #tpu.memory_space<vmem>>, vector<64x16xf32>
    %c0_1 = arith.constant 0 : index
    %c0_2 = arith.constant 0 : index
    %1 = vector.load %arg1[%c0_1, %c0_2] : memref<16x96xf32, #tpu.memory_space<vmem>>, vector<16x96xf32>
    %cst = arith.constant dense<0.000000e+00> : vector<64x96xf32>
    %2 = tpu.matmul %0, %1, %cst {dimension_numbers = #tpu.dot_dimension_numbers<[1], [0], [0], [1], [0, 0, 1, 1], [], []>} : vector<64x16xf32>, vector<16x96xf32>, vector<64x96xf32> -> vector<64x96xf32>
    %c0_3 = arith.constant 0 : index
    %c0_4 = arith.constant 0 : index
    %3 = vector.load %arg3[%c0_3, %c0_4] : memref<1x96xf32, #tpu.memory_space<vmem>>, vector<1x96xf32>
    %4 = vector.broadcast %3 : vector<1x96xf32> to vector<64x96xf32>
    %5 = arith.addf %2, %4 : vector<64x96xf32>
    %c0_5 = arith.constant 0 : index
    %c0_6 = arith.constant 0 : index
    %6 = vector.load %arg2[%c0_5, %c0_6] : memref<32x96xf32, #tpu.memory_space<vmem>>, vector<32x96xf32>
    %c0_7 = arith.constant 0 : index
    %c0_8 = arith.constant 0 : index
    %7 = vector.load %arg4[%c0_7, %c0_8] : memref<1x96xf32, #tpu.memory_space<vmem>>, vector<1x96xf32>
    %8 = vector.shape_cast %7 : vector<1x96xf32> to vector<1x96xf32>
    %9 = vector.broadcast %8 : vector<1x96xf32> to vector<8x96xf32>
    %cst_9 = arith.constant 0.000000e+00 : f32
    %10 = vector.broadcast %cst_9 : f32 to vector<8x32xf32>
    %11 = vector.extract_strided_slice %5 {offsets = [0, 0], sizes = [8, 96], strides = [1, 1]} : vector<64x96xf32> to vector<8x96xf32>
    %cst_10 = arith.constant dense<0.000000e+00> : vector<8x96xf32>
    %12 = tpu.matmul %10, %6, %cst_10 {dimension_numbers = #tpu.dot_dimension_numbers<[1], [0], [0], [1], [0, 0, 1, 1], [], []>} : vector<8x32xf32>, vector<32x96xf32>, vector<8x96xf32> -> vector<8x96xf32>
    %13 = arith.addf %12, %9 : vector<8x96xf32>
    %14 = vector.extract_strided_slice %11 {offsets = [0, 0], sizes = [8, 64], strides = [1, 1]} : vector<8x96xf32> to vector<8x64xf32>
    %15 = vector.extract_strided_slice %13 {offsets = [0, 0], sizes = [8, 64], strides = [1, 1]} : vector<8x96xf32> to vector<8x64xf32>
    %16 = arith.addf %14, %15 : vector<8x64xf32>
    %cst_11 = arith.constant 5.000000e-01 : f32
    %17 = vector.broadcast %cst_11 : f32 to vector<8x64xf32>
    %18 = arith.mulf %17, %16 : vector<8x64xf32>
    %19 = math.tanh %18 : vector<8x64xf32>
    %cst_12 = arith.constant 1.000000e+00 : f32
    %20 = vector.broadcast %cst_12 : f32 to vector<8x64xf32>
    %21 = arith.addf %19, %20 : vector<8x64xf32>
    %cst_13 = arith.constant 5.000000e-01 : f32
    %22 = vector.broadcast %cst_13 : f32 to vector<8x64xf32>
    %23 = arith.mulf %22, %21 : vector<8x64xf32>
    %24 = vector.extract_strided_slice %23 {offsets = [0, 0], sizes = [8, 32], strides = [1, 1]} : vector<8x64xf32> to vector<8x32xf32>
    %25 = vector.extract_strided_slice %23 {offsets = [0, 32], sizes = [8, 32], strides = [1, 1]} : vector<8x64xf32> to vector<8x32xf32>
    %26 = vector.extract_strided_slice %11 {offsets = [0, 64], sizes = [8, 32], strides = [1, 1]} : vector<8x96xf32> to vector<8x32xf32>
    %27 = vector.extract_strided_slice %13 {offsets = [0, 64], sizes = [8, 32], strides = [1, 1]} : vector<8x96xf32> to vector<8x32xf32>
    %28 = arith.mulf %24, %27 : vector<8x32xf32>
    %29 = arith.addf %26, %28 : vector<8x32xf32>
    %30 = math.tanh %29 : vector<8x32xf32>
    %31 = arith.subf %10, %30 : vector<8x32xf32>
    %32 = arith.mulf %25, %31 : vector<8x32xf32>
    %33 = arith.addf %30, %32 : vector<8x32xf32>
    %34 = vector.extract_strided_slice %5 {offsets = [8, 0], sizes = [8, 96], strides = [1, 1]} : vector<64x96xf32> to vector<8x96xf32>
    %cst_14 = arith.constant dense<0.000000e+00> : vector<8x96xf32>
    %35 = tpu.matmul %33, %6, %cst_14 {dimension_numbers = #tpu.dot_dimension_numbers<[1], [0], [0], [1], [0, 0, 1, 1], [], []>} : vector<8x32xf32>, vector<32x96xf32>, vector<8x96xf32> -> vector<8x96xf32>
    %36 = arith.addf %35, %9 : vector<8x96xf32>
    %37 = vector.extract_strided_slice %34 {offsets = [0, 0], sizes = [8, 64], strides = [1, 1]} : vector<8x96xf32> to vector<8x64xf32>
    %38 = vector.extract_strided_slice %36 {offsets = [0, 0], sizes = [8, 64], strides = [1, 1]} : vector<8x96xf32> to vector<8x64xf32>
    %39 = arith.addf %37, %38 : vector<8x64xf32>
    %cst_15 = arith.constant 5.000000e-01 : f32
    %40 = vector.broadcast %cst_15 : f32 to vector<8x64xf32>
    %41 = arith.mulf %40, %39 : vector<8x64xf32>
    %42 = math.tanh %41 : vector<8x64xf32>
    %cst_16 = arith.constant 1.000000e+00 : f32
    %43 = vector.broadcast %cst_16 : f32 to vector<8x64xf32>
    %44 = arith.addf %42, %43 : vector<8x64xf32>
    %cst_17 = arith.constant 5.000000e-01 : f32
    %45 = vector.broadcast %cst_17 : f32 to vector<8x64xf32>
    %46 = arith.mulf %45, %44 : vector<8x64xf32>
    %47 = vector.extract_strided_slice %46 {offsets = [0, 0], sizes = [8, 32], strides = [1, 1]} : vector<8x64xf32> to vector<8x32xf32>
    %48 = vector.extract_strided_slice %46 {offsets = [0, 32], sizes = [8, 32], strides = [1, 1]} : vector<8x64xf32> to vector<8x32xf32>
    %49 = vector.extract_strided_slice %34 {offsets = [0, 64], sizes = [8, 32], strides = [1, 1]} : vector<8x96xf32> to vector<8x32xf32>
    %50 = vector.extract_strided_slice %36 {offsets = [0, 64], sizes = [8, 32], strides = [1, 1]} : vector<8x96xf32> to vector<8x32xf32>
    %51 = arith.mulf %47, %50 : vector<8x32xf32>
    %52 = arith.addf %49, %51 : vector<8x32xf32>
    %53 = math.tanh %52 : vector<8x32xf32>
    %54 = arith.subf %33, %53 : vector<8x32xf32>
    %55 = arith.mulf %48, %54 : vector<8x32xf32>
    %56 = arith.addf %53, %55 : vector<8x32xf32>
    %57 = vector.extract_strided_slice %5 {offsets = [16, 0], sizes = [8, 96], strides = [1, 1]} : vector<64x96xf32> to vector<8x96xf32>
    %cst_18 = arith.constant dense<0.000000e+00> : vector<8x96xf32>
    %58 = tpu.matmul %56, %6, %cst_18 {dimension_numbers = #tpu.dot_dimension_numbers<[1], [0], [0], [1], [0, 0, 1, 1], [], []>} : vector<8x32xf32>, vector<32x96xf32>, vector<8x96xf32> -> vector<8x96xf32>
    %59 = arith.addf %58, %9 : vector<8x96xf32>
    %60 = vector.extract_strided_slice %57 {offsets = [0, 0], sizes = [8, 64], strides = [1, 1]} : vector<8x96xf32> to vector<8x64xf32>
    %61 = vector.extract_strided_slice %59 {offsets = [0, 0], sizes = [8, 64], strides = [1, 1]} : vector<8x96xf32> to vector<8x64xf32>
    %62 = arith.addf %60, %61 : vector<8x64xf32>
    %cst_19 = arith.constant 5.000000e-01 : f32
    %63 = vector.broadcast %cst_19 : f32 to vector<8x64xf32>
    %64 = arith.mulf %63, %62 : vector<8x64xf32>
    %65 = math.tanh %64 : vector<8x64xf32>
    %cst_20 = arith.constant 1.000000e+00 : f32
    %66 = vector.broadcast %cst_20 : f32 to vector<8x64xf32>
    %67 = arith.addf %65, %66 : vector<8x64xf32>
    %cst_21 = arith.constant 5.000000e-01 : f32
    %68 = vector.broadcast %cst_21 : f32 to vector<8x64xf32>
    %69 = arith.mulf %68, %67 : vector<8x64xf32>
    %70 = vector.extract_strided_slice %69 {offsets = [0, 0], sizes = [8, 32], strides = [1, 1]} : vector<8x64xf32> to vector<8x32xf32>
    %71 = vector.extract_strided_slice %69 {offsets = [0, 32], sizes = [8, 32], strides = [1, 1]} : vector<8x64xf32> to vector<8x32xf32>
    %72 = vector.extract_strided_slice %57 {offsets = [0, 64], sizes = [8, 32], strides = [1, 1]} : vector<8x96xf32> to vector<8x32xf32>
    %73 = vector.extract_strided_slice %59 {offsets = [0, 64], sizes = [8, 32], strides = [1, 1]} : vector<8x96xf32> to vector<8x32xf32>
    %74 = arith.mulf %70, %73 : vector<8x32xf32>
    %75 = arith.addf %72, %74 : vector<8x32xf32>
    %76 = math.tanh %75 : vector<8x32xf32>
    %77 = arith.subf %56, %76 : vector<8x32xf32>
    %78 = arith.mulf %71, %77 : vector<8x32xf32>
    %79 = arith.addf %76, %78 : vector<8x32xf32>
    %80 = vector.extract_strided_slice %5 {offsets = [24, 0], sizes = [8, 96], strides = [1, 1]} : vector<64x96xf32> to vector<8x96xf32>
    %cst_22 = arith.constant dense<0.000000e+00> : vector<8x96xf32>
    %81 = tpu.matmul %79, %6, %cst_22 {dimension_numbers = #tpu.dot_dimension_numbers<[1], [0], [0], [1], [0, 0, 1, 1], [], []>} : vector<8x32xf32>, vector<32x96xf32>, vector<8x96xf32> -> vector<8x96xf32>
    %82 = arith.addf %81, %9 : vector<8x96xf32>
    %83 = vector.extract_strided_slice %80 {offsets = [0, 0], sizes = [8, 64], strides = [1, 1]} : vector<8x96xf32> to vector<8x64xf32>
    %84 = vector.extract_strided_slice %82 {offsets = [0, 0], sizes = [8, 64], strides = [1, 1]} : vector<8x96xf32> to vector<8x64xf32>
    %85 = arith.addf %83, %84 : vector<8x64xf32>
    %cst_23 = arith.constant 5.000000e-01 : f32
    %86 = vector.broadcast %cst_23 : f32 to vector<8x64xf32>
    %87 = arith.mulf %86, %85 : vector<8x64xf32>
    %88 = math.tanh %87 : vector<8x64xf32>
    %cst_24 = arith.constant 1.000000e+00 : f32
    %89 = vector.broadcast %cst_24 : f32 to vector<8x64xf32>
    %90 = arith.addf %88, %89 : vector<8x64xf32>
    %cst_25 = arith.constant 5.000000e-01 : f32
    %91 = vector.broadcast %cst_25 : f32 to vector<8x64xf32>
    %92 = arith.mulf %91, %90 : vector<8x64xf32>
    %93 = vector.extract_strided_slice %92 {offsets = [0, 0], sizes = [8, 32], strides = [1, 1]} : vector<8x64xf32> to vector<8x32xf32>
    %94 = vector.extract_strided_slice %92 {offsets = [0, 32], sizes = [8, 32], strides = [1, 1]} : vector<8x64xf32> to vector<8x32xf32>
    %95 = vector.extract_strided_slice %80 {offsets = [0, 64], sizes = [8, 32], strides = [1, 1]} : vector<8x96xf32> to vector<8x32xf32>
    %96 = vector.extract_strided_slice %82 {offsets = [0, 64], sizes = [8, 32], strides = [1, 1]} : vector<8x96xf32> to vector<8x32xf32>
    %97 = arith.mulf %93, %96 : vector<8x32xf32>
    %98 = arith.addf %95, %97 : vector<8x32xf32>
    %99 = math.tanh %98 : vector<8x32xf32>
    %100 = arith.subf %79, %99 : vector<8x32xf32>
    %101 = arith.mulf %94, %100 : vector<8x32xf32>
    %102 = arith.addf %99, %101 : vector<8x32xf32>
    %103 = vector.extract_strided_slice %5 {offsets = [32, 0], sizes = [8, 96], strides = [1, 1]} : vector<64x96xf32> to vector<8x96xf32>
    %cst_26 = arith.constant dense<0.000000e+00> : vector<8x96xf32>
    %104 = tpu.matmul %102, %6, %cst_26 {dimension_numbers = #tpu.dot_dimension_numbers<[1], [0], [0], [1], [0, 0, 1, 1], [], []>} : vector<8x32xf32>, vector<32x96xf32>, vector<8x96xf32> -> vector<8x96xf32>
    %105 = arith.addf %104, %9 : vector<8x96xf32>
    %106 = vector.extract_strided_slice %103 {offsets = [0, 0], sizes = [8, 64], strides = [1, 1]} : vector<8x96xf32> to vector<8x64xf32>
    %107 = vector.extract_strided_slice %105 {offsets = [0, 0], sizes = [8, 64], strides = [1, 1]} : vector<8x96xf32> to vector<8x64xf32>
    %108 = arith.addf %106, %107 : vector<8x64xf32>
    %cst_27 = arith.constant 5.000000e-01 : f32
    %109 = vector.broadcast %cst_27 : f32 to vector<8x64xf32>
    %110 = arith.mulf %109, %108 : vector<8x64xf32>
    %111 = math.tanh %110 : vector<8x64xf32>
    %cst_28 = arith.constant 1.000000e+00 : f32
    %112 = vector.broadcast %cst_28 : f32 to vector<8x64xf32>
    %113 = arith.addf %111, %112 : vector<8x64xf32>
    %cst_29 = arith.constant 5.000000e-01 : f32
    %114 = vector.broadcast %cst_29 : f32 to vector<8x64xf32>
    %115 = arith.mulf %114, %113 : vector<8x64xf32>
    %116 = vector.extract_strided_slice %115 {offsets = [0, 0], sizes = [8, 32], strides = [1, 1]} : vector<8x64xf32> to vector<8x32xf32>
    %117 = vector.extract_strided_slice %115 {offsets = [0, 32], sizes = [8, 32], strides = [1, 1]} : vector<8x64xf32> to vector<8x32xf32>
    %118 = vector.extract_strided_slice %103 {offsets = [0, 64], sizes = [8, 32], strides = [1, 1]} : vector<8x96xf32> to vector<8x32xf32>
    %119 = vector.extract_strided_slice %105 {offsets = [0, 64], sizes = [8, 32], strides = [1, 1]} : vector<8x96xf32> to vector<8x32xf32>
    %120 = arith.mulf %116, %119 : vector<8x32xf32>
    %121 = arith.addf %118, %120 : vector<8x32xf32>
    %122 = math.tanh %121 : vector<8x32xf32>
    %123 = arith.subf %102, %122 : vector<8x32xf32>
    %124 = arith.mulf %117, %123 : vector<8x32xf32>
    %125 = arith.addf %122, %124 : vector<8x32xf32>
    %126 = vector.extract_strided_slice %5 {offsets = [40, 0], sizes = [8, 96], strides = [1, 1]} : vector<64x96xf32> to vector<8x96xf32>
    %cst_30 = arith.constant dense<0.000000e+00> : vector<8x96xf32>
    %127 = tpu.matmul %125, %6, %cst_30 {dimension_numbers = #tpu.dot_dimension_numbers<[1], [0], [0], [1], [0, 0, 1, 1], [], []>} : vector<8x32xf32>, vector<32x96xf32>, vector<8x96xf32> -> vector<8x96xf32>
    %128 = arith.addf %127, %9 : vector<8x96xf32>
    %129 = vector.extract_strided_slice %126 {offsets = [0, 0], sizes = [8, 64], strides = [1, 1]} : vector<8x96xf32> to vector<8x64xf32>
    %130 = vector.extract_strided_slice %128 {offsets = [0, 0], sizes = [8, 64], strides = [1, 1]} : vector<8x96xf32> to vector<8x64xf32>
    %131 = arith.addf %129, %130 : vector<8x64xf32>
    %cst_31 = arith.constant 5.000000e-01 : f32
    %132 = vector.broadcast %cst_31 : f32 to vector<8x64xf32>
    %133 = arith.mulf %132, %131 : vector<8x64xf32>
    %134 = math.tanh %133 : vector<8x64xf32>
    %cst_32 = arith.constant 1.000000e+00 : f32
    %135 = vector.broadcast %cst_32 : f32 to vector<8x64xf32>
    %136 = arith.addf %134, %135 : vector<8x64xf32>
    %cst_33 = arith.constant 5.000000e-01 : f32
    %137 = vector.broadcast %cst_33 : f32 to vector<8x64xf32>
    %138 = arith.mulf %137, %136 : vector<8x64xf32>
    %139 = vector.extract_strided_slice %138 {offsets = [0, 0], sizes = [8, 32], strides = [1, 1]} : vector<8x64xf32> to vector<8x32xf32>
    %140 = vector.extract_strided_slice %138 {offsets = [0, 32], sizes = [8, 32], strides = [1, 1]} : vector<8x64xf32> to vector<8x32xf32>
    %141 = vector.extract_strided_slice %126 {offsets = [0, 64], sizes = [8, 32], strides = [1, 1]} : vector<8x96xf32> to vector<8x32xf32>
    %142 = vector.extract_strided_slice %128 {offsets = [0, 64], sizes = [8, 32], strides = [1, 1]} : vector<8x96xf32> to vector<8x32xf32>
    %143 = arith.mulf %139, %142 : vector<8x32xf32>
    %144 = arith.addf %141, %143 : vector<8x32xf32>
    %145 = math.tanh %144 : vector<8x32xf32>
    %146 = arith.subf %125, %145 : vector<8x32xf32>
    %147 = arith.mulf %140, %146 : vector<8x32xf32>
    %148 = arith.addf %145, %147 : vector<8x32xf32>
    %149 = vector.extract_strided_slice %5 {offsets = [48, 0], sizes = [8, 96], strides = [1, 1]} : vector<64x96xf32> to vector<8x96xf32>
    %cst_34 = arith.constant dense<0.000000e+00> : vector<8x96xf32>
    %150 = tpu.matmul %148, %6, %cst_34 {dimension_numbers = #tpu.dot_dimension_numbers<[1], [0], [0], [1], [0, 0, 1, 1], [], []>} : vector<8x32xf32>, vector<32x96xf32>, vector<8x96xf32> -> vector<8x96xf32>
    %151 = arith.addf %150, %9 : vector<8x96xf32>
    %152 = vector.extract_strided_slice %149 {offsets = [0, 0], sizes = [8, 64], strides = [1, 1]} : vector<8x96xf32> to vector<8x64xf32>
    %153 = vector.extract_strided_slice %151 {offsets = [0, 0], sizes = [8, 64], strides = [1, 1]} : vector<8x96xf32> to vector<8x64xf32>
    %154 = arith.addf %152, %153 : vector<8x64xf32>
    %cst_35 = arith.constant 5.000000e-01 : f32
    %155 = vector.broadcast %cst_35 : f32 to vector<8x64xf32>
    %156 = arith.mulf %155, %154 : vector<8x64xf32>
    %157 = math.tanh %156 : vector<8x64xf32>
    %cst_36 = arith.constant 1.000000e+00 : f32
    %158 = vector.broadcast %cst_36 : f32 to vector<8x64xf32>
    %159 = arith.addf %157, %158 : vector<8x64xf32>
    %cst_37 = arith.constant 5.000000e-01 : f32
    %160 = vector.broadcast %cst_37 : f32 to vector<8x64xf32>
    %161 = arith.mulf %160, %159 : vector<8x64xf32>
    %162 = vector.extract_strided_slice %161 {offsets = [0, 0], sizes = [8, 32], strides = [1, 1]} : vector<8x64xf32> to vector<8x32xf32>
    %163 = vector.extract_strided_slice %161 {offsets = [0, 32], sizes = [8, 32], strides = [1, 1]} : vector<8x64xf32> to vector<8x32xf32>
    %164 = vector.extract_strided_slice %149 {offsets = [0, 64], sizes = [8, 32], strides = [1, 1]} : vector<8x96xf32> to vector<8x32xf32>
    %165 = vector.extract_strided_slice %151 {offsets = [0, 64], sizes = [8, 32], strides = [1, 1]} : vector<8x96xf32> to vector<8x32xf32>
    %166 = arith.mulf %162, %165 : vector<8x32xf32>
    %167 = arith.addf %164, %166 : vector<8x32xf32>
    %168 = math.tanh %167 : vector<8x32xf32>
    %169 = arith.subf %148, %168 : vector<8x32xf32>
    %170 = arith.mulf %163, %169 : vector<8x32xf32>
    %171 = arith.addf %168, %170 : vector<8x32xf32>
    %172 = vector.extract_strided_slice %5 {offsets = [56, 0], sizes = [8, 96], strides = [1, 1]} : vector<64x96xf32> to vector<8x96xf32>
    %cst_38 = arith.constant dense<0.000000e+00> : vector<8x96xf32>
    %173 = tpu.matmul %171, %6, %cst_38 {dimension_numbers = #tpu.dot_dimension_numbers<[1], [0], [0], [1], [0, 0, 1, 1], [], []>} : vector<8x32xf32>, vector<32x96xf32>, vector<8x96xf32> -> vector<8x96xf32>
    %174 = arith.addf %173, %9 : vector<8x96xf32>
    %175 = vector.extract_strided_slice %172 {offsets = [0, 0], sizes = [8, 64], strides = [1, 1]} : vector<8x96xf32> to vector<8x64xf32>
    %176 = vector.extract_strided_slice %174 {offsets = [0, 0], sizes = [8, 64], strides = [1, 1]} : vector<8x96xf32> to vector<8x64xf32>
    %177 = arith.addf %175, %176 : vector<8x64xf32>
    %cst_39 = arith.constant 5.000000e-01 : f32
    %178 = vector.broadcast %cst_39 : f32 to vector<8x64xf32>
    %179 = arith.mulf %178, %177 : vector<8x64xf32>
    %180 = math.tanh %179 : vector<8x64xf32>
    %cst_40 = arith.constant 1.000000e+00 : f32
    %181 = vector.broadcast %cst_40 : f32 to vector<8x64xf32>
    %182 = arith.addf %180, %181 : vector<8x64xf32>
    %cst_41 = arith.constant 5.000000e-01 : f32
    %183 = vector.broadcast %cst_41 : f32 to vector<8x64xf32>
    %184 = arith.mulf %183, %182 : vector<8x64xf32>
    %185 = vector.extract_strided_slice %184 {offsets = [0, 0], sizes = [8, 32], strides = [1, 1]} : vector<8x64xf32> to vector<8x32xf32>
    %186 = vector.extract_strided_slice %184 {offsets = [0, 32], sizes = [8, 32], strides = [1, 1]} : vector<8x64xf32> to vector<8x32xf32>
    %187 = vector.extract_strided_slice %172 {offsets = [0, 64], sizes = [8, 32], strides = [1, 1]} : vector<8x96xf32> to vector<8x32xf32>
    %188 = vector.extract_strided_slice %174 {offsets = [0, 64], sizes = [8, 32], strides = [1, 1]} : vector<8x96xf32> to vector<8x32xf32>
    %189 = arith.mulf %185, %188 : vector<8x32xf32>
    %190 = arith.addf %187, %189 : vector<8x32xf32>
    %191 = math.tanh %190 : vector<8x32xf32>
    %192 = arith.subf %171, %191 : vector<8x32xf32>
    %193 = arith.mulf %186, %192 : vector<8x32xf32>
    %194 = arith.addf %191, %193 : vector<8x32xf32>
    %195 = tpu.concatenate %33, %56, %79, %102, %125, %148, %171, %194 in 0 : vector<8x32xf32>, vector<8x32xf32>, vector<8x32xf32>, vector<8x32xf32>, vector<8x32xf32>, vector<8x32xf32>, vector<8x32xf32>, vector<8x32xf32> -> vector<64x32xf32>
    %c0_42 = arith.constant 0 : index
    %c0_43 = arith.constant 0 : index
    %196 = vector.load %arg5[%c0_42, %c0_43] : memref<32x96xf32, #tpu.memory_space<vmem>>, vector<32x96xf32>
    %cst_44 = arith.constant dense<0.000000e+00> : vector<64x96xf32>
    %197 = tpu.matmul %195, %196, %cst_44 {dimension_numbers = #tpu.dot_dimension_numbers<[1], [0], [0], [1], [0, 0, 1, 1], [], []>} : vector<64x32xf32>, vector<32x96xf32>, vector<64x96xf32> -> vector<64x96xf32>
    %c0_45 = arith.constant 0 : index
    %c0_46 = arith.constant 0 : index
    %198 = vector.load %arg7[%c0_45, %c0_46] : memref<1x96xf32, #tpu.memory_space<vmem>>, vector<1x96xf32>
    %199 = vector.broadcast %198 : vector<1x96xf32> to vector<64x96xf32>
    %200 = arith.addf %197, %199 : vector<64x96xf32>
    %c0_47 = arith.constant 0 : index
    %c0_48 = arith.constant 0 : index
    %201 = vector.load %arg6[%c0_47, %c0_48] : memref<32x96xf32, #tpu.memory_space<vmem>>, vector<32x96xf32>
    %c0_49 = arith.constant 0 : index
    %c0_50 = arith.constant 0 : index
    %202 = vector.load %arg8[%c0_49, %c0_50] : memref<1x96xf32, #tpu.memory_space<vmem>>, vector<1x96xf32>
    %203 = vector.shape_cast %202 : vector<1x96xf32> to vector<1x96xf32>
    %204 = vector.broadcast %203 : vector<1x96xf32> to vector<8x96xf32>
    %cst_51 = arith.constant 0.000000e+00 : f32
    %205 = vector.broadcast %cst_51 : f32 to vector<8x32xf32>
    %206 = vector.extract_strided_slice %200 {offsets = [0, 0], sizes = [8, 96], strides = [1, 1]} : vector<64x96xf32> to vector<8x96xf32>
    %cst_52 = arith.constant dense<0.000000e+00> : vector<8x96xf32>
    %207 = tpu.matmul %205, %201, %cst_52 {dimension_numbers = #tpu.dot_dimension_numbers<[1], [0], [0], [1], [0, 0, 1, 1], [], []>} : vector<8x32xf32>, vector<32x96xf32>, vector<8x96xf32> -> vector<8x96xf32>
    %208 = arith.addf %207, %204 : vector<8x96xf32>
    %209 = vector.extract_strided_slice %206 {offsets = [0, 0], sizes = [8, 64], strides = [1, 1]} : vector<8x96xf32> to vector<8x64xf32>
    %210 = vector.extract_strided_slice %208 {offsets = [0, 0], sizes = [8, 64], strides = [1, 1]} : vector<8x96xf32> to vector<8x64xf32>
    %211 = arith.addf %209, %210 : vector<8x64xf32>
    %cst_53 = arith.constant 5.000000e-01 : f32
    %212 = vector.broadcast %cst_53 : f32 to vector<8x64xf32>
    %213 = arith.mulf %212, %211 : vector<8x64xf32>
    %214 = math.tanh %213 : vector<8x64xf32>
    %cst_54 = arith.constant 1.000000e+00 : f32
    %215 = vector.broadcast %cst_54 : f32 to vector<8x64xf32>
    %216 = arith.addf %214, %215 : vector<8x64xf32>
    %cst_55 = arith.constant 5.000000e-01 : f32
    %217 = vector.broadcast %cst_55 : f32 to vector<8x64xf32>
    %218 = arith.mulf %217, %216 : vector<8x64xf32>
    %219 = vector.extract_strided_slice %218 {offsets = [0, 0], sizes = [8, 32], strides = [1, 1]} : vector<8x64xf32> to vector<8x32xf32>
    %220 = vector.extract_strided_slice %218 {offsets = [0, 32], sizes = [8, 32], strides = [1, 1]} : vector<8x64xf32> to vector<8x32xf32>
    %221 = vector.extract_strided_slice %206 {offsets = [0, 64], sizes = [8, 32], strides = [1, 1]} : vector<8x96xf32> to vector<8x32xf32>
    %222 = vector.extract_strided_slice %208 {offsets = [0, 64], sizes = [8, 32], strides = [1, 1]} : vector<8x96xf32> to vector<8x32xf32>
    %223 = arith.mulf %219, %222 : vector<8x32xf32>
    %224 = arith.addf %221, %223 : vector<8x32xf32>
    %225 = math.tanh %224 : vector<8x32xf32>
    %226 = arith.subf %205, %225 : vector<8x32xf32>
    %227 = arith.mulf %220, %226 : vector<8x32xf32>
    %228 = arith.addf %225, %227 : vector<8x32xf32>
    %229 = vector.extract_strided_slice %200 {offsets = [8, 0], sizes = [8, 96], strides = [1, 1]} : vector<64x96xf32> to vector<8x96xf32>
    %cst_56 = arith.constant dense<0.000000e+00> : vector<8x96xf32>
    %230 = tpu.matmul %228, %201, %cst_56 {dimension_numbers = #tpu.dot_dimension_numbers<[1], [0], [0], [1], [0, 0, 1, 1], [], []>} : vector<8x32xf32>, vector<32x96xf32>, vector<8x96xf32> -> vector<8x96xf32>
    %231 = arith.addf %230, %204 : vector<8x96xf32>
    %232 = vector.extract_strided_slice %229 {offsets = [0, 0], sizes = [8, 64], strides = [1, 1]} : vector<8x96xf32> to vector<8x64xf32>
    %233 = vector.extract_strided_slice %231 {offsets = [0, 0], sizes = [8, 64], strides = [1, 1]} : vector<8x96xf32> to vector<8x64xf32>
    %234 = arith.addf %232, %233 : vector<8x64xf32>
    %cst_57 = arith.constant 5.000000e-01 : f32
    %235 = vector.broadcast %cst_57 : f32 to vector<8x64xf32>
    %236 = arith.mulf %235, %234 : vector<8x64xf32>
    %237 = math.tanh %236 : vector<8x64xf32>
    %cst_58 = arith.constant 1.000000e+00 : f32
    %238 = vector.broadcast %cst_58 : f32 to vector<8x64xf32>
    %239 = arith.addf %237, %238 : vector<8x64xf32>
    %cst_59 = arith.constant 5.000000e-01 : f32
    %240 = vector.broadcast %cst_59 : f32 to vector<8x64xf32>
    %241 = arith.mulf %240, %239 : vector<8x64xf32>
    %242 = vector.extract_strided_slice %241 {offsets = [0, 0], sizes = [8, 32], strides = [1, 1]} : vector<8x64xf32> to vector<8x32xf32>
    %243 = vector.extract_strided_slice %241 {offsets = [0, 32], sizes = [8, 32], strides = [1, 1]} : vector<8x64xf32> to vector<8x32xf32>
    %244 = vector.extract_strided_slice %229 {offsets = [0, 64], sizes = [8, 32], strides = [1, 1]} : vector<8x96xf32> to vector<8x32xf32>
    %245 = vector.extract_strided_slice %231 {offsets = [0, 64], sizes = [8, 32], strides = [1, 1]} : vector<8x96xf32> to vector<8x32xf32>
    %246 = arith.mulf %242, %245 : vector<8x32xf32>
    %247 = arith.addf %244, %246 : vector<8x32xf32>
    %248 = math.tanh %247 : vector<8x32xf32>
    %249 = arith.subf %228, %248 : vector<8x32xf32>
    %250 = arith.mulf %243, %249 : vector<8x32xf32>
    %251 = arith.addf %248, %250 : vector<8x32xf32>
    %252 = vector.extract_strided_slice %200 {offsets = [16, 0], sizes = [8, 96], strides = [1, 1]} : vector<64x96xf32> to vector<8x96xf32>
    %cst_60 = arith.constant dense<0.000000e+00> : vector<8x96xf32>
    %253 = tpu.matmul %251, %201, %cst_60 {dimension_numbers = #tpu.dot_dimension_numbers<[1], [0], [0], [1], [0, 0, 1, 1], [], []>} : vector<8x32xf32>, vector<32x96xf32>, vector<8x96xf32> -> vector<8x96xf32>
    %254 = arith.addf %253, %204 : vector<8x96xf32>
    %255 = vector.extract_strided_slice %252 {offsets = [0, 0], sizes = [8, 64], strides = [1, 1]} : vector<8x96xf32> to vector<8x64xf32>
    %256 = vector.extract_strided_slice %254 {offsets = [0, 0], sizes = [8, 64], strides = [1, 1]} : vector<8x96xf32> to vector<8x64xf32>
    %257 = arith.addf %255, %256 : vector<8x64xf32>
    %cst_61 = arith.constant 5.000000e-01 : f32
    %258 = vector.broadcast %cst_61 : f32 to vector<8x64xf32>
    %259 = arith.mulf %258, %257 : vector<8x64xf32>
    %260 = math.tanh %259 : vector<8x64xf32>
    %cst_62 = arith.constant 1.000000e+00 : f32
    %261 = vector.broadcast %cst_62 : f32 to vector<8x64xf32>
    %262 = arith.addf %260, %261 : vector<8x64xf32>
    %cst_63 = arith.constant 5.000000e-01 : f32
    %263 = vector.broadcast %cst_63 : f32 to vector<8x64xf32>
    %264 = arith.mulf %263, %262 : vector<8x64xf32>
    %265 = vector.extract_strided_slice %264 {offsets = [0, 0], sizes = [8, 32], strides = [1, 1]} : vector<8x64xf32> to vector<8x32xf32>
    %266 = vector.extract_strided_slice %264 {offsets = [0, 32], sizes = [8, 32], strides = [1, 1]} : vector<8x64xf32> to vector<8x32xf32>
    %267 = vector.extract_strided_slice %252 {offsets = [0, 64], sizes = [8, 32], strides = [1, 1]} : vector<8x96xf32> to vector<8x32xf32>
    %268 = vector.extract_strided_slice %254 {offsets = [0, 64], sizes = [8, 32], strides = [1, 1]} : vector<8x96xf32> to vector<8x32xf32>
    %269 = arith.mulf %265, %268 : vector<8x32xf32>
    %270 = arith.addf %267, %269 : vector<8x32xf32>
    %271 = math.tanh %270 : vector<8x32xf32>
    %272 = arith.subf %251, %271 : vector<8x32xf32>
    %273 = arith.mulf %266, %272 : vector<8x32xf32>
    %274 = arith.addf %271, %273 : vector<8x32xf32>
    %275 = vector.extract_strided_slice %200 {offsets = [24, 0], sizes = [8, 96], strides = [1, 1]} : vector<64x96xf32> to vector<8x96xf32>
    %cst_64 = arith.constant dense<0.000000e+00> : vector<8x96xf32>
    %276 = tpu.matmul %274, %201, %cst_64 {dimension_numbers = #tpu.dot_dimension_numbers<[1], [0], [0], [1], [0, 0, 1, 1], [], []>} : vector<8x32xf32>, vector<32x96xf32>, vector<8x96xf32> -> vector<8x96xf32>
    %277 = arith.addf %276, %204 : vector<8x96xf32>
    %278 = vector.extract_strided_slice %275 {offsets = [0, 0], sizes = [8, 64], strides = [1, 1]} : vector<8x96xf32> to vector<8x64xf32>
    %279 = vector.extract_strided_slice %277 {offsets = [0, 0], sizes = [8, 64], strides = [1, 1]} : vector<8x96xf32> to vector<8x64xf32>
    %280 = arith.addf %278, %279 : vector<8x64xf32>
    %cst_65 = arith.constant 5.000000e-01 : f32
    %281 = vector.broadcast %cst_65 : f32 to vector<8x64xf32>
    %282 = arith.mulf %281, %280 : vector<8x64xf32>
    %283 = math.tanh %282 : vector<8x64xf32>
    %cst_66 = arith.constant 1.000000e+00 : f32
    %284 = vector.broadcast %cst_66 : f32 to vector<8x64xf32>
    %285 = arith.addf %283, %284 : vector<8x64xf32>
    %cst_67 = arith.constant 5.000000e-01 : f32
    %286 = vector.broadcast %cst_67 : f32 to vector<8x64xf32>
    %287 = arith.mulf %286, %285 : vector<8x64xf32>
    %288 = vector.extract_strided_slice %287 {offsets = [0, 0], sizes = [8, 32], strides = [1, 1]} : vector<8x64xf32> to vector<8x32xf32>
    %289 = vector.extract_strided_slice %287 {offsets = [0, 32], sizes = [8, 32], strides = [1, 1]} : vector<8x64xf32> to vector<8x32xf32>
    %290 = vector.extract_strided_slice %275 {offsets = [0, 64], sizes = [8, 32], strides = [1, 1]} : vector<8x96xf32> to vector<8x32xf32>
    %291 = vector.extract_strided_slice %277 {offsets = [0, 64], sizes = [8, 32], strides = [1, 1]} : vector<8x96xf32> to vector<8x32xf32>
    %292 = arith.mulf %288, %291 : vector<8x32xf32>
    %293 = arith.addf %290, %292 : vector<8x32xf32>
    %294 = math.tanh %293 : vector<8x32xf32>
    %295 = arith.subf %274, %294 : vector<8x32xf32>
    %296 = arith.mulf %289, %295 : vector<8x32xf32>
    %297 = arith.addf %294, %296 : vector<8x32xf32>
    %298 = vector.extract_strided_slice %200 {offsets = [32, 0], sizes = [8, 96], strides = [1, 1]} : vector<64x96xf32> to vector<8x96xf32>
    %cst_68 = arith.constant dense<0.000000e+00> : vector<8x96xf32>
    %299 = tpu.matmul %297, %201, %cst_68 {dimension_numbers = #tpu.dot_dimension_numbers<[1], [0], [0], [1], [0, 0, 1, 1], [], []>} : vector<8x32xf32>, vector<32x96xf32>, vector<8x96xf32> -> vector<8x96xf32>
    %300 = arith.addf %299, %204 : vector<8x96xf32>
    %301 = vector.extract_strided_slice %298 {offsets = [0, 0], sizes = [8, 64], strides = [1, 1]} : vector<8x96xf32> to vector<8x64xf32>
    %302 = vector.extract_strided_slice %300 {offsets = [0, 0], sizes = [8, 64], strides = [1, 1]} : vector<8x96xf32> to vector<8x64xf32>
    %303 = arith.addf %301, %302 : vector<8x64xf32>
    %cst_69 = arith.constant 5.000000e-01 : f32
    %304 = vector.broadcast %cst_69 : f32 to vector<8x64xf32>
    %305 = arith.mulf %304, %303 : vector<8x64xf32>
    %306 = math.tanh %305 : vector<8x64xf32>
    %cst_70 = arith.constant 1.000000e+00 : f32
    %307 = vector.broadcast %cst_70 : f32 to vector<8x64xf32>
    %308 = arith.addf %306, %307 : vector<8x64xf32>
    %cst_71 = arith.constant 5.000000e-01 : f32
    %309 = vector.broadcast %cst_71 : f32 to vector<8x64xf32>
    %310 = arith.mulf %309, %308 : vector<8x64xf32>
    %311 = vector.extract_strided_slice %310 {offsets = [0, 0], sizes = [8, 32], strides = [1, 1]} : vector<8x64xf32> to vector<8x32xf32>
    %312 = vector.extract_strided_slice %310 {offsets = [0, 32], sizes = [8, 32], strides = [1, 1]} : vector<8x64xf32> to vector<8x32xf32>
    %313 = vector.extract_strided_slice %298 {offsets = [0, 64], sizes = [8, 32], strides = [1, 1]} : vector<8x96xf32> to vector<8x32xf32>
    %314 = vector.extract_strided_slice %300 {offsets = [0, 64], sizes = [8, 32], strides = [1, 1]} : vector<8x96xf32> to vector<8x32xf32>
    %315 = arith.mulf %311, %314 : vector<8x32xf32>
    %316 = arith.addf %313, %315 : vector<8x32xf32>
    %317 = math.tanh %316 : vector<8x32xf32>
    %318 = arith.subf %297, %317 : vector<8x32xf32>
    %319 = arith.mulf %312, %318 : vector<8x32xf32>
    %320 = arith.addf %317, %319 : vector<8x32xf32>
    %321 = vector.extract_strided_slice %200 {offsets = [40, 0], sizes = [8, 96], strides = [1, 1]} : vector<64x96xf32> to vector<8x96xf32>
    %cst_72 = arith.constant dense<0.000000e+00> : vector<8x96xf32>
    %322 = tpu.matmul %320, %201, %cst_72 {dimension_numbers = #tpu.dot_dimension_numbers<[1], [0], [0], [1], [0, 0, 1, 1], [], []>} : vector<8x32xf32>, vector<32x96xf32>, vector<8x96xf32> -> vector<8x96xf32>
    %323 = arith.addf %322, %204 : vector<8x96xf32>
    %324 = vector.extract_strided_slice %321 {offsets = [0, 0], sizes = [8, 64], strides = [1, 1]} : vector<8x96xf32> to vector<8x64xf32>
    %325 = vector.extract_strided_slice %323 {offsets = [0, 0], sizes = [8, 64], strides = [1, 1]} : vector<8x96xf32> to vector<8x64xf32>
    %326 = arith.addf %324, %325 : vector<8x64xf32>
    %cst_73 = arith.constant 5.000000e-01 : f32
    %327 = vector.broadcast %cst_73 : f32 to vector<8x64xf32>
    %328 = arith.mulf %327, %326 : vector<8x64xf32>
    %329 = math.tanh %328 : vector<8x64xf32>
    %cst_74 = arith.constant 1.000000e+00 : f32
    %330 = vector.broadcast %cst_74 : f32 to vector<8x64xf32>
    %331 = arith.addf %329, %330 : vector<8x64xf32>
    %cst_75 = arith.constant 5.000000e-01 : f32
    %332 = vector.broadcast %cst_75 : f32 to vector<8x64xf32>
    %333 = arith.mulf %332, %331 : vector<8x64xf32>
    %334 = vector.extract_strided_slice %333 {offsets = [0, 0], sizes = [8, 32], strides = [1, 1]} : vector<8x64xf32> to vector<8x32xf32>
    %335 = vector.extract_strided_slice %333 {offsets = [0, 32], sizes = [8, 32], strides = [1, 1]} : vector<8x64xf32> to vector<8x32xf32>
    %336 = vector.extract_strided_slice %321 {offsets = [0, 64], sizes = [8, 32], strides = [1, 1]} : vector<8x96xf32> to vector<8x32xf32>
    %337 = vector.extract_strided_slice %323 {offsets = [0, 64], sizes = [8, 32], strides = [1, 1]} : vector<8x96xf32> to vector<8x32xf32>
    %338 = arith.mulf %334, %337 : vector<8x32xf32>
    %339 = arith.addf %336, %338 : vector<8x32xf32>
    %340 = math.tanh %339 : vector<8x32xf32>
    %341 = arith.subf %320, %340 : vector<8x32xf32>
    %342 = arith.mulf %335, %341 : vector<8x32xf32>
    %343 = arith.addf %340, %342 : vector<8x32xf32>
    %344 = vector.extract_strided_slice %200 {offsets = [48, 0], sizes = [8, 96], strides = [1, 1]} : vector<64x96xf32> to vector<8x96xf32>
    %cst_76 = arith.constant dense<0.000000e+00> : vector<8x96xf32>
    %345 = tpu.matmul %343, %201, %cst_76 {dimension_numbers = #tpu.dot_dimension_numbers<[1], [0], [0], [1], [0, 0, 1, 1], [], []>} : vector<8x32xf32>, vector<32x96xf32>, vector<8x96xf32> -> vector<8x96xf32>
    %346 = arith.addf %345, %204 : vector<8x96xf32>
    %347 = vector.extract_strided_slice %344 {offsets = [0, 0], sizes = [8, 64], strides = [1, 1]} : vector<8x96xf32> to vector<8x64xf32>
    %348 = vector.extract_strided_slice %346 {offsets = [0, 0], sizes = [8, 64], strides = [1, 1]} : vector<8x96xf32> to vector<8x64xf32>
    %349 = arith.addf %347, %348 : vector<8x64xf32>
    %cst_77 = arith.constant 5.000000e-01 : f32
    %350 = vector.broadcast %cst_77 : f32 to vector<8x64xf32>
    %351 = arith.mulf %350, %349 : vector<8x64xf32>
    %352 = math.tanh %351 : vector<8x64xf32>
    %cst_78 = arith.constant 1.000000e+00 : f32
    %353 = vector.broadcast %cst_78 : f32 to vector<8x64xf32>
    %354 = arith.addf %352, %353 : vector<8x64xf32>
    %cst_79 = arith.constant 5.000000e-01 : f32
    %355 = vector.broadcast %cst_79 : f32 to vector<8x64xf32>
    %356 = arith.mulf %355, %354 : vector<8x64xf32>
    %357 = vector.extract_strided_slice %356 {offsets = [0, 0], sizes = [8, 32], strides = [1, 1]} : vector<8x64xf32> to vector<8x32xf32>
    %358 = vector.extract_strided_slice %356 {offsets = [0, 32], sizes = [8, 32], strides = [1, 1]} : vector<8x64xf32> to vector<8x32xf32>
    %359 = vector.extract_strided_slice %344 {offsets = [0, 64], sizes = [8, 32], strides = [1, 1]} : vector<8x96xf32> to vector<8x32xf32>
    %360 = vector.extract_strided_slice %346 {offsets = [0, 64], sizes = [8, 32], strides = [1, 1]} : vector<8x96xf32> to vector<8x32xf32>
    %361 = arith.mulf %357, %360 : vector<8x32xf32>
    %362 = arith.addf %359, %361 : vector<8x32xf32>
    %363 = math.tanh %362 : vector<8x32xf32>
    %364 = arith.subf %343, %363 : vector<8x32xf32>
    %365 = arith.mulf %358, %364 : vector<8x32xf32>
    %366 = arith.addf %363, %365 : vector<8x32xf32>
    %367 = vector.extract_strided_slice %200 {offsets = [56, 0], sizes = [8, 96], strides = [1, 1]} : vector<64x96xf32> to vector<8x96xf32>
    %cst_80 = arith.constant dense<0.000000e+00> : vector<8x96xf32>
    %368 = tpu.matmul %366, %201, %cst_80 {dimension_numbers = #tpu.dot_dimension_numbers<[1], [0], [0], [1], [0, 0, 1, 1], [], []>} : vector<8x32xf32>, vector<32x96xf32>, vector<8x96xf32> -> vector<8x96xf32>
    %369 = arith.addf %368, %204 : vector<8x96xf32>
    %370 = vector.extract_strided_slice %367 {offsets = [0, 0], sizes = [8, 64], strides = [1, 1]} : vector<8x96xf32> to vector<8x64xf32>
    %371 = vector.extract_strided_slice %369 {offsets = [0, 0], sizes = [8, 64], strides = [1, 1]} : vector<8x96xf32> to vector<8x64xf32>
    %372 = arith.addf %370, %371 : vector<8x64xf32>
    %cst_81 = arith.constant 5.000000e-01 : f32
    %373 = vector.broadcast %cst_81 : f32 to vector<8x64xf32>
    %374 = arith.mulf %373, %372 : vector<8x64xf32>
    %375 = math.tanh %374 : vector<8x64xf32>
    %cst_82 = arith.constant 1.000000e+00 : f32
    %376 = vector.broadcast %cst_82 : f32 to vector<8x64xf32>
    %377 = arith.addf %375, %376 : vector<8x64xf32>
    %cst_83 = arith.constant 5.000000e-01 : f32
    %378 = vector.broadcast %cst_83 : f32 to vector<8x64xf32>
    %379 = arith.mulf %378, %377 : vector<8x64xf32>
    %380 = vector.extract_strided_slice %379 {offsets = [0, 0], sizes = [8, 32], strides = [1, 1]} : vector<8x64xf32> to vector<8x32xf32>
    %381 = vector.extract_strided_slice %379 {offsets = [0, 32], sizes = [8, 32], strides = [1, 1]} : vector<8x64xf32> to vector<8x32xf32>
    %382 = vector.extract_strided_slice %367 {offsets = [0, 64], sizes = [8, 32], strides = [1, 1]} : vector<8x96xf32> to vector<8x32xf32>
    %383 = vector.extract_strided_slice %369 {offsets = [0, 64], sizes = [8, 32], strides = [1, 1]} : vector<8x96xf32> to vector<8x32xf32>
    %384 = arith.mulf %380, %383 : vector<8x32xf32>
    %385 = arith.addf %382, %384 : vector<8x32xf32>
    %386 = math.tanh %385 : vector<8x32xf32>
    %387 = arith.subf %366, %386 : vector<8x32xf32>
    %388 = arith.mulf %381, %387 : vector<8x32xf32>
    %389 = arith.addf %386, %388 : vector<8x32xf32>
    %c0_84 = arith.constant 0 : index
    %c0_85 = arith.constant 0 : index
    %390 = vector.load %arg9[%c0_84, %c0_85] : memref<32x8xf32, #tpu.memory_space<vmem>>, vector<32x8xf32>
    %cst_86 = arith.constant dense<0.000000e+00> : vector<8x8xf32>
    %391 = tpu.matmul %389, %390, %cst_86 {dimension_numbers = #tpu.dot_dimension_numbers<[1], [0], [0], [1], [0, 0, 1, 1], [], []>} : vector<8x32xf32>, vector<32x8xf32>, vector<8x8xf32> -> vector<8x8xf32>
    %c0_87 = arith.constant 0 : index
    %c0_88 = arith.constant 0 : index
    %392 = vector.load %arg10[%c0_87, %c0_88] : memref<1x8xf32, #tpu.memory_space<vmem>>, vector<1x8xf32>
    %393 = vector.broadcast %392 : vector<1x8xf32> to vector<8x8xf32>
    %394 = arith.addf %391, %393 : vector<8x8xf32>
    %c0_89 = arith.constant 0 : index
    %c0_90 = arith.constant 0 : index
    %395 = vector.load %arg11[%c0_89, %c0_90] : memref<8x8xf32, #tpu.memory_space<vmem>>, vector<8x8xf32>
    tpu.vector_store %arg11[%c0_89, %c0_90], %394 {strides = array<i32>} : memref<8x8xf32, #tpu.memory_space<vmem>>, vector<8x8xf32>,
    return
  }
}

</mosaic_0001>

<bundles_post_ra>
// kernel: gru_model_forward.1
= control target key start
LH: loop header
LB: loop body
LE: loop exit
PB: predicated region body
PF: predicated region fallthrough
CT: control target
= control target key end

     0   :  { %v2596_v0 = vmov 0.0|0.0   ;;  %vm55_vm0 = vcmask 130048   ;;  %vm2597_vm1 = vmmov 0   ;;  %v2598_v4 = vmov 0.0   ;;  %s2599_s14 = smov 64   ;;  %s3072_s2 = inlined_call_operand.vmem [shape: f32[32,96], index: 2, kind: input, shape index: {}]   ;;  %s3073_s1 = inlined_call_operand.vmem [shape: f32[16,96], index: 1, kind: input, shape index: {}]   ;;  %s3074_s0 = inlined_call_operand.vmem [shape: f32[64,16], index: 0, kind: input, shape index: {}]   ;;  %s3075_s4 = inlined_call_operand.vmem [shape: f32[1,96], index: 4, kind: input, shape index: {}]   ;;  %s3076_s3 = inlined_call_operand.vmem [shape: f32[1,96], index: 3, kind: input, shape index: {}]   ;;  %s3077_s5 = inlined_call_operand.vmem [shape: f32[32,96], index: 5, kind: input, shape index: {}]   ;;  %s3078_s6 = inlined_call_operand.vmem [shape: f32[32,96], index: 6, kind: input, shape index: {}]   ;;  %s3079_s8 = inlined_call_operand.vmem [shape: f32[1,96], index: 8, kind: input, shape index: {}]   ;;  %s3080_s7 = inlined_call_operand.vmem [shape: f32[1,96], index: 7, kind: input, shape index: {}]   ;;  %s3081_s9 = inlined_call_operand.vmem [shape: f32[32,8], index: 9, kind: input, shape index: {}]   ;;  %s3082_s10 = inlined_call_operand.vmem [shape: f32[1,8], index: 10, kind: input, shape index: {}]   ;;  %s3083_s11 = inlined_call_operand.vmem [shape: f32[8,8], index: 11, kind: output, shape index: {}]  }
   0x1   :  { %2416 = vmatprep.subr.bf16.mxu1 %v2596_v0  ;;  %v185_v1 = vld [vmem:[%s3072_s2] sm:$0xff]  ;;  %v186_v2 = vld [vmem:[%s3072_s2 + $0x8] sm:$0xff]  ;;  %2213 = vmatprep.mubr.msk.f32.mxu1 %vm2597_vm1, %v2598_v4  ;;  %v187_v7 = vld [vmem:[%s3072_s2 + $0x10] sm:$0xff]  ;;  %vm196_vm2 = vcmask 261120   ;;  %vm2040_vm3 = vcmask 64512  }
   0x2   :  { %v46_v3 = vld [vmem:[%s3073_s1] sm:$0xff]  ;;  %v2674_v5 = vpack.c.bf16 %v186_v2, %v185_v1  ;;  %v47_v6 = vld [vmem:[%s3073_s1 + $0x8] sm:$0xff]  ;;  %v188_v8 = vld [vmem:[%s3072_s2 + $0x18] sm:$0xff] }
   0x3   :  { %v2412_v9 = vpack.c.bf16 %v47_v6, %v46_v3  ;;  %v38_v10 = vld [vmem:[%s3074_s0] sm:$0xff]  ;;  %v2689_v11 = vpack.c.bf16 %v188_v8, %v187_v7  ;;  %v39_v12 = vld [vmem:[%s3074_s0 + $0x8] sm:$0xff]  ;;  %v40_v52 = vld [vmem:[%s3074_s0 + $0x10] sm:$0xff] }
   0x4   :  { %2418 = vmatpush3.bf16.msra.mxu1 %v2674_v5  ;;  %2193 = vmatprep.mubr.msk.f32.mxu0 %vm55_vm0, %v38_v10  ;;  %v2714_v14 = vld [vmem:[%s3075_s4] ss:$0 sm:$0xff]  ;;  %s2600_s4 = smov 96   ;;  %v41_v53 = vld [vmem:[%s3074_s0 + $0x18] sm:$0xff]  ;;  %v43_v55 = vld [vmem:[%s3074_s0 + $0x28] sm:$0xff] }
   0x5   :  { %2413 = vmatprep.subr.bf16.mxu0 %v2412_v9  ;;  %2419 = vmatprep.subr.bf16.mxu1 %v2596_v0  ;;  %v2721_v19 = vld [vmem:[%s3076_s3] ss:$0 sm:$0xff]  ;;  %s2601_s3 = smov 32   ;;  %v44_v56 = vld [vmem:[%s3074_s0 + $0x30] sm:$0xff]  ;;  %v45_v57 = vld [vmem:[%s3074_s0 + $0x38] sm:$0xff] }
   0x6   :  { %2415 = vmatpush3.bf16.msra.mxu0 %v2412_v9  ;;  %v42_v54 = vld [vmem:[%s3074_s0 + $0x20] sm:$0xff] }
   0x7   :  { %2428 = vmatprep.subr.bf16.mxu0 %v2596_v0 }
   0x8   :  { %2421 = vmatpush3.bf16.msra.mxu1 %v2689_v11 }
   0x9   :  { %2194 = vmatmul.mubr.msk.f32.vlgmr.msra.gmra.mrb[0].mxu0 %vm55_vm0, %v39_v12  ;;  %2422 = vmatprep.subr.bf16.mxu1 %v2596_v0 }
   0xa   :  { %2430 = vmatpush3.bf16.msra.mxu0 %v2674_v5  ;;  %2196 = vmatprep.mubr.msk.f32.mxu0 %vm55_vm0, %v40_v52 }
   0xb   :  { %2214 = vmatmul.mubr.f32.vlgmr.msra.gmra.mrb[0].mxu1 %v2598_v4  ;;  %2431 = vmatprep.subr.bf16.mxu0 %v2596_v0 }
   0xc   :  { %2424 = vmatpush3.bf16.msra.mxu1 %v2674_v5  ;;  %2224 = vmatprep.mubr.msk.f32.mxu1 %vm2597_vm1, %v2598_v4 }
   0xd   :  { %2425 = vmatprep.subr.bf16.mxu1 %v2596_v0  ;;  %2197 = vmatmul.mubr.msk.f32.gmra.mrb[2].mxu0 %vm55_vm0, %v41_v53 }
   0xe   :  { %2433 = vmatpush3.bf16.msra.mxu0 %v2689_v11  ;;  %2199 = vmatprep.mubr.msk.f32.mxu0 %vm55_vm0, %v42_v54 }
   0xf   :  { %2440 = vmatprep.subr.bf16.mxu0 %v2596_v0 }
  0x10   :  { %2427 = vmatpush3.bf16.msra.mxu1 %v2689_v11 }
  0x11   :  { %2434 = vmatprep.subr.bf16.mxu1 %v2596_v0  ;;  %2200 = vmatmul.mubr.msk.f32.gmra.mrb[4].mxu0 %vm55_vm0, %v43_v55 }
  0x12   :  { %2202 = vmatprep.mubr.msk.f32.mxu0 %vm55_vm0, %v44_v56 }
  0x15   :  { %2203 = vmatmul.mubr.msk.f32.gmra.mrb[6].mxu0 %vm55_vm0, %v45_v57 }
  0x16   :  { %2235 = vmatprep.mubr.msk.f32.mxu0 %vm2597_vm1, %v2598_v4 }
  0xdc   :  { %v2195_v13 = vpop.f32.mrb[0].mxu0 }
  0xdd   :  { %v146_v15 = vpop.f32.mrb[1].mxu0  ;;  %v152_v40 = vadd.f32 %v2195_v13, %v2721_v19 }
  0xde   :  { %v266_v16 = vpop.f32.mrb[0].mxu1  ;;  %v147_v20 = vadd.f32 %v2721_v19, %v146_v15 }
  0xdf   :  { %v267_v17 = vadd.f32 %v2714_v14, %v266_v16  ;;  %v2215_v18 = vpop.f32.mrb[1].mxu1 }
  0xe0   :  { %v2198_v62 = vpop.f32.mrb[2].mxu0 }
  0xe1   :  { %276 = vrot.lane.b32.xlu0 %v267_v17, %s2599_s14  ;;  %v270_v21 = vadd.f32 %v267_v17, %v147_v20  ;;  %v156_v63 = vpop.f32.mrb[3].mxu0 }
  0xe2   :  { %v157_v12 = vadd.f32 %v2721_v19, %v156_v63 }
  0xe3   :  { %v271_v22 = vmul.f32 0.5, %v270_v21 }
  0xe4   :  { %v2771_v1 = vpop.f32.mrb[4].mxu0 }
  0xe5   :  { %2532 = vtanh.f32 %v271_v22  ;;  %v2773_v2 = vpop.f32.mrb[5].mxu0 }
  0xe6   :  { %v167_v55 = vadd.f32 %v2721_v19, %v2773_v2 }
  0xe8   :  { %v2775_v3 = vpop.f32.mrb[6].mxu0 }
  0xe9   :  { %v2777_v6 = vpop.f32.mrb[7].mxu0 }
  0xef   :  { %v2533_v23 = vpop.eup %2532 }
  0xf0   :  { %v273_v24 = vadd.f32 1.0, %v2533_v23 }
  0xf2   :  { %v274_v25 = vmul.f32 0.5, %v273_v24 }
 0x153   :  { %v277_v26 = vpop.permute.xlu0 %276 }
 0x154   :  { %v279_v27 = vmul.f32 %v277_v26, %v274_v25 }
 0x156   :  { %281 = vrot.lane.b32.xlu0 %v279_v27, %s2599_s14 }
 0x1c8   :  { %v282_v28 = vpop.permute.xlu0 %281 }
 0x1c9   :  { %v284_v29 = vadd.f32 %v282_v28, %v147_v20 }
 0x1cb   :  { %2534 = vtanh.f32 %v284_v29 }
 0x1d5   :  { %v2535_v30 = vpop.eup %2534 }
 0x1d6   :  { %v286_v31 = vsub.f32 0.0, %v2535_v30 }
 0x1d8   :  { %288 = vrot.lane.b32.xlu1 %v286_v31, %s2600_s4 }
 0x24a   :  { %v289_v32 = vpop.permute.xlu1 %288 }
 0x24b   :  { %v291_v33 = vmul.f32 %v289_v32, %v274_v25 }
 0x24d   :  { %293 = vrot.lane.b32.xlu1 %v291_v33, %s2601_s3 }
 0x2bf   :  { %v294_v34 = vpop.permute.xlu1 %293 }
 0x2c0   :  { %v296_v35 = vadd.f32 %v2535_v30, %v294_v34  ;;  %v162_v34 = vadd.f32 %v2198_v62, %v2721_v19 }
 0x2c2   :  { %298 = vrot.lane.b32.xlu0 %v296_v35, %s2599_s14 }
 0x334   :  { %v2728_v36 = vpop.permute.xlu0 %298 }
 0x335   :  { %2225 = vmatmul.mubr.msk.f32.vlgmr.msra.gmra.mrb[2].mxu1 %vm196_vm2, %v2728_v36 }
 0x336   :  { %2436 = vmatpush3.bf16.msra.mxu1 %v2674_v5  ;;  %2246 = vmatprep.mubr.msk.f32.mxu1 %vm2597_vm1, %v2598_v4 }
 0x337   :  { %2437 = vmatprep.subr.bf16.mxu1 %v2596_v0 }
 0x33a   :  { %2439 = vmatpush3.bf16.msra.mxu1 %v2689_v11 }
 0x33b   :  { %2446 = vmatprep.subr.bf16.mxu1 %v2596_v0 }
 0x408   :  { %v368_v37 = vpop.f32.mrb[2].mxu1 }
 0x409   :  { %v369_v38 = vadd.f32 %v2714_v14, %v368_v37  ;;  %v2226_v39 = vpop.f32.mrb[3].mxu1 }
 0x40b   :  { %378 = vrot.lane.b32.xlu1 %v369_v38, %s2599_s14  ;;  %v372_v41 = vadd.f32 %v369_v38, %v152_v40 }
 0x40d   :  { %v373_v42 = vmul.f32 0.5, %v372_v41 }
 0x40f   :  { %2536 = vtanh.f32 %v373_v42 }
 0x419   :  { %v2537_v43 = vpop.eup %2536 }
 0x41a   :  { %v375_v44 = vadd.f32 1.0, %v2537_v43 }
 0x41c   :  { %v376_v45 = vmul.f32 0.5, %v375_v44 }
 0x47d   :  { %v379_v46 = vpop.permute.xlu1 %378 }
 0x47e   :  { %v381_v47 = vmul.f32 %v379_v46, %v376_v45 }
 0x480   :  { %383 = vrot.lane.b32.xlu0 %v381_v47, %s2599_s14 }
 0x4f2   :  { %v384_v48 = vpop.permute.xlu0 %383 }
 0x4f3   :  { %v386_v49 = vadd.f32 %v384_v48, %v152_v40 }
 0x4f5   :  { %2538 = vtanh.f32 %v386_v49 }
 0x4ff   :  { %v2539_v50 = vpop.eup %2538 }
 0x500   :  { %v388_v51 = vsub.f32 %v296_v35, %v2539_v50 }
 0x502   :  { %390 = vrot.lane.b32.xlu1 %v388_v51, %s2600_s4 }
 0x574   :  { %v391_v58 = vpop.permute.xlu1 %390 }
 0x575   :  { %v393_v59 = vmul.f32 %v391_v58, %v376_v45 }
 0x577   :  { %395 = vrot.lane.b32.xlu0 %v393_v59, %s2601_s3 }
 0x5e9   :  { %v396_v60 = vpop.permute.xlu0 %395 }
 0x5ea   :  { %v398_v61 = vadd.f32 %v2539_v50, %v396_v60 }
 0x5ec   :  { %400 = vrot.lane.b32.xlu1 %v398_v61, %s2599_s14 }
 0x65e   :  { %v2779_v7 = vpop.permute.xlu1 %400 }
 0x65f   :  { %2236 = vmatmul.mubr.msk.f32.vlgmr.msra.gmra.mrb[8].mxu0 %vm196_vm2, %v2779_v7 }
 0x660   :  { %2442 = vmatpush3.bf16.msra.mxu0 %v2674_v5  ;;  %2257 = vmatprep.mubr.msk.f32.mxu0 %vm2597_vm1, %v2598_v4 }
 0x661   :  { %2443 = vmatprep.subr.bf16.mxu0 %v2596_v0 }
 0x664   :  { %2445 = vmatpush3.bf16.msra.mxu0 %v2689_v11 }
 0x665   :  { %2452 = vmatprep.subr.bf16.mxu0 %v2596_v0 }
 0x732   :  { %v470_v8 = vpop.f32.mrb[8].mxu0 }
 0x733   :  { %v471_v9 = vadd.f32 %v2714_v14, %v470_v8  ;;  %v2237_v10 = vpop.f32.mrb[9].mxu0 }
 0x735   :  { %480 = vrot.lane.b32.xlu0 %v471_v9, %s2599_s14  ;;  %v474_v13 = vadd.f32 %v471_v9, %v157_v12 }
 0x737   :  { %v475_v15 = vmul.f32 0.5, %v474_v13 }
 0x739   :  { %2540 = vtanh.f32 %v475_v15 }
 0x743   :  { %v2541_v16 = vpop.eup %2540 }
 0x744   :  { %v477_v17 = vadd.f32 1.0, %v2541_v16 }
 0x746   :  { %v478_v18 = vmul.f32 0.5, %v477_v17 }
 0x7a7   :  { %v481_v20 = vpop.permute.xlu0 %480 }
 0x7a8   :  { %v483_v21 = vmul.f32 %v481_v20, %v478_v18 }
 0x7aa   :  { %485 = vrot.lane.b32.xlu1 %v483_v21, %s2599_s14  ;;  %v172_v21 = vadd.f32 %v2771_v1, %v2721_v19  ;;  %v1011_v1 = vld [vmem:[%s3077_s5] sm:$0xff] }
 0x81c   :  { %v486_v22 = vpop.permute.xlu1 %485 }
 0x81d   :  { %v488_v23 = vadd.f32 %v486_v22, %v157_v12 }
 0x81f   :  { %2542 = vtanh.f32 %v488_v23 }
 0x829   :  { %v2543_v24 = vpop.eup %2542 }
 0x82a   :  { %v490_v25 = vsub.f32 %v398_v61, %v2543_v24 }
 0x82c   :  { %492 = vrot.lane.b32.xlu0 %v490_v25, %s2600_s4 }
 0x89e   :  { %v493_v26 = vpop.permute.xlu0 %492 }
 0x89f   :  { %v495_v27 = vmul.f32 %v493_v26, %v478_v18 }
 0x8a1   :  { %497 = vrot.lane.b32.xlu1 %v495_v27, %s2601_s3 }
 0x913   :  { %v498_v28 = vpop.permute.xlu1 %497 }
 0x914   :  { %v500_v29 = vadd.f32 %v2543_v24, %v498_v28 }
 0x916   :  { %502 = vrot.lane.b32.xlu0 %v500_v29, %s2599_s14 }
 0x988   :  { %v2796_v30 = vpop.permute.xlu0 %502 }
 0x989   :  { %2247 = vmatmul.mubr.msk.f32.vlgmr.msra.gmra.mrb[4].mxu1 %vm196_vm2, %v2796_v30 }
 0x98a   :  { %2448 = vmatpush3.bf16.msra.mxu1 %v2674_v5  ;;  %2268 = vmatprep.mubr.msk.f32.mxu1 %vm2597_vm1, %v2598_v4 }
 0x98b   :  { %2449 = vmatprep.subr.bf16.mxu1 %v2596_v0 }
 0x98e   :  { %2451 = vmatpush3.bf16.msra.mxu1 %v2689_v11 }
 0x98f   :  { %2458 = vmatprep.subr.bf16.mxu1 %v2596_v0 }
 0xa5c   :  { %v572_v31 = vpop.f32.mrb[4].mxu1 }
 0xa5d   :  { %v573_v32 = vadd.f32 %v2714_v14, %v572_v31  ;;  %v2248_v33 = vpop.f32.mrb[5].mxu1 }
 0xa5f   :  { %582 = vrot.lane.b32.xlu1 %v573_v32, %s2599_s14  ;;  %v576_v35 = vadd.f32 %v573_v32, %v162_v34  ;;  %v1012_v32 = vld [vmem:[%s3077_s5 + $0x8] sm:$0xff] }
 0xa60   :  { %v2464_v33 = vpack.c.bf16 %v1012_v32, %v1011_v1 }
 0xa61   :  { %v577_v37 = vmul.f32 0.5, %v576_v35 }
 0xa63   :  { %2544 = vtanh.f32 %v577_v37 }
 0xa6d   :  { %v2545_v38 = vpop.eup %2544 }
 0xa6e   :  { %v579_v39 = vadd.f32 1.0, %v2545_v38 }
 0xa70   :  { %v580_v40 = vmul.f32 0.5, %v579_v39  ;;  %v1013_v39 = vld [vmem:[%s3077_s5 + $0x10] sm:$0xff] }
 0xad1   :  { %v583_v41 = vpop.permute.xlu1 %582 }
 0xad2   :  { %v585_v42 = vmul.f32 %v583_v41, %v580_v40 }
 0xad4   :  { %587 = vrot.lane.b32.xlu0 %v585_v42, %s2599_s14 }
 0xb46   :  { %v588_v43 = vpop.permute.xlu0 %587 }
 0xb47   :  { %v590_v44 = vadd.f32 %v588_v43, %v162_v34 }
 0xb49   :  { %2546 = vtanh.f32 %v590_v44 }
 0xb53   :  { %v2547_v45 = vpop.eup %2546 }
 0xb54   :  { %v592_v46 = vsub.f32 %v500_v29, %v2547_v45 }
 0xb56   :  { %594 = vrot.lane.b32.xlu1 %v592_v46, %s2600_s4 }
 0xbc8   :  { %v595_v47 = vpop.permute.xlu1 %594 }
 0xbc9   :  { %v597_v48 = vmul.f32 %v595_v47, %v580_v40  ;;  %v1014_v40 = vld [vmem:[%s3077_s5 + $0x18] sm:$0xff] }
 0xbca   :  { %v2468_v41 = vpack.c.bf16 %v1014_v40, %v1013_v39 }
 0xbcb   :  { %599 = vrot.lane.b32.xlu0 %v597_v48, %s2601_s3 }
 0xc3d   :  { %v600_v49 = vpop.permute.xlu0 %599 }
 0xc3e   :  { %v602_v50 = vadd.f32 %v2547_v45, %v600_v49  ;;  %v177_v49 = vadd.f32 %v2721_v19, %v2777_v6  ;;  %v1132_v6 = vld [vmem:[%s3078_s6] sm:$0xff] }
 0xc40   :  { %604 = vrot.lane.b32.xlu1 %v602_v50, %s2599_s14 }
 0xcb2   :  { %v2813_v51 = vpop.permute.xlu1 %604 }
 0xcb3   :  { %2258 = vmatmul.mubr.msk.f32.vlgmr.msra.gmra.mrb[10].mxu0 %vm196_vm2, %v2813_v51 }
 0xcb4   :  { %2454 = vmatpush3.bf16.msra.mxu0 %v2674_v5  ;;  %2279 = vmatprep.mubr.msk.f32.mxu0 %vm2597_vm1, %v2598_v4 }
 0xcb5   :  { %2455 = vmatprep.subr.bf16.mxu0 %v2596_v0 }
 0xcb8   :  { %2457 = vmatpush3.bf16.msra.mxu0 %v2689_v11 }
 0xcb9   :  { %2465 = vmatprep.subr.bf16.mxu0 %v2464_v33 }
 0xd86   :  { %v674_v52 = vpop.f32.mrb[10].mxu0 }
 0xd87   :  { %v675_v53 = vadd.f32 %v2714_v14, %v674_v52  ;;  %v2259_v54 = vpop.f32.mrb[11].mxu0 }
 0xd89   :  { %684 = vrot.lane.b32.xlu0 %v675_v53, %s2599_s14  ;;  %v678_v56 = vadd.f32 %v675_v53, %v167_v55 }
 0xd8b   :  { %v679_v57 = vmul.f32 0.5, %v678_v56 }
 0xd8d   :  { %2548 = vtanh.f32 %v679_v57 }
 0xd97   :  { %v2549_v58 = vpop.eup %2548 }
 0xd98   :  { %v681_v59 = vadd.f32 1.0, %v2549_v58 }
 0xd9a   :  { %v682_v60 = vmul.f32 0.5, %v681_v59 }
 0xdfb   :  { %v685_v61 = vpop.permute.xlu0 %684 }
 0xdfc   :  { %v687_v62 = vmul.f32 %v685_v61, %v682_v60 }
 0xdfe   :  { %689 = vrot.lane.b32.xlu1 %v687_v62, %s2599_s14 }
 0xe70   :  { %v690_v63 = vpop.permute.xlu1 %689 }
 0xe71   :  { %v692_v8 = vadd.f32 %v690_v63, %v167_v55  ;;  %v1133_v63 = vld [vmem:[%s3078_s6 + $0x8] sm:$0xff] }
 0xe73   :  { %2550 = vtanh.f32 %v692_v8  ;;  %v2892_v8 = vpack.c.bf16 %v1133_v63, %v1132_v6 }
 0xe7d   :  { %v2551_v9 = vpop.eup %2550 }
 0xe7e   :  { %v694_v10 = vsub.f32 %v602_v50, %v2551_v9 }
 0xe80   :  { %696 = vrot.lane.b32.xlu0 %v694_v10, %s2600_s4  ;;  %v1135_v10 = vld [vmem:[%s3078_s6 + $0x18] sm:$0xff] }
 0xef2   :  { %v697_v12 = vpop.permute.xlu0 %696 }
 0xef3   :  { %v699_v13 = vmul.f32 %v697_v12, %v682_v60 }
 0xef5   :  { %701 = vrot.lane.b32.xlu1 %v699_v13, %s2601_s3 }
 0xf67   :  { %v702_v2 = vpop.permute.xlu1 %701 }
 0xf68   :  { %v704_v15 = vadd.f32 %v2551_v9, %v702_v2  ;;  %v1134_v9 = vld [vmem:[%s3078_s6 + $0x10] sm:$0xff] }
 0xf69   :  { %v2902_v12 = vpack.c.bf16 %v1135_v10, %v1134_v9 }
 0xf6a   :  { %706 = vrot.lane.b32.xlu0 %v704_v15, %s2599_s14 }
 0xfdc   :  { %v707_v16 = vpop.permute.xlu0 %706 }
 0xfdd   :  { %2269 = vmatmul.mubr.msk.f32.vlgmr.msra.gmra.mrb[6].mxu1 %vm196_vm2, %v707_v16 }
 0xfde   :  { %2460 = vmatpush3.bf16.msra.mxu1 %v2674_v5  ;;  %2290 = vmatprep.mubr.msk.f32.mxu1 %vm2597_vm1, %v2598_v4 }
 0xfdf   :  { %2461 = vmatprep.subr.bf16.mxu1 %v2596_v0 }
 0xfe2   :  { %2463 = vmatpush3.bf16.msra.mxu1 %v2689_v11 }
 0xfe3   :  { %2472 = vmatprep.subr.bf16.mxu1 %v2596_v0 }
0x10b0   :  { %v776_v17 = vpop.f32.mrb[6].mxu1 }
0x10b1   :  { %v777_v18 = vadd.f32 %v2714_v14, %v776_v17  ;;  %v2270_v20 = vpop.f32.mrb[7].mxu1 }
0x10b3   :  { %786 = vrot.lane.b32.xlu1 %v777_v18, %s2599_s14  ;;  %v780_v22 = vadd.f32 %v777_v18, %v172_v21  ;;  %v2928_v18 = vld [vmem:[%s3079_s8] ss:$0 sm:$0xff] }
0x10b5   :  { %v781_v5 = vmul.f32 0.5, %v780_v22 }
0x10b7   :  { %2552 = vtanh.f32 %v781_v5  ;;  %v2935_v5 = vld [vmem:[%s3080_s7] ss:$0 sm:$0xff] }
0x10c1   :  { %v2553_v23 = vpop.eup %2552 }
0x10c2   :  { %v783_v24 = vadd.f32 1.0, %v2553_v23 }
0x10c4   :  { %v784_v25 = vmul.f32 0.5, %v783_v24 }
0x1125   :  { %v787_v26 = vpop.permute.xlu1 %786 }
0x1126   :  { %v789_v27 = vmul.f32 %v787_v26, %v784_v25 }
0x1128   :  { %791 = vrot.lane.b32.xlu0 %v789_v27, %s2599_s14 }
0x119a   :  { %v792_v11 = vpop.permute.xlu0 %791 }
0x119b   :  { %v794_v28 = vadd.f32 %v792_v11, %v172_v21 }
0x119d   :  { %2554 = vtanh.f32 %v794_v28 }
0x11a7   :  { %v2555_v29 = vpop.eup %2554 }
0x11a8   :  { %v796_v31 = vsub.f32 %v704_v15, %v2555_v29 }
0x11aa   :  { %798 = vrot.lane.b32.xlu1 %v796_v31, %s2600_s4 }
0x121c   :  { %v799_v34 = vpop.permute.xlu1 %798 }
0x121d   :  { %v801_v35 = vmul.f32 %v799_v34, %v784_v25 }
0x121f   :  { %803 = vrot.lane.b32.xlu0 %v801_v35, %s2601_s3 }
0x1291   :  { %v804_v37 = vpop.permute.xlu0 %803 }
0x1292   :  { %v806_v38 = vadd.f32 %v2555_v29, %v804_v37 }
0x1294   :  { %808 = vrot.lane.b32.xlu1 %v806_v38, %s2599_s14 }
0x1306   :  { %v809_v42 = vpop.permute.xlu1 %808 }
0x1307   :  { %2280 = vmatmul.mubr.msk.f32.vlgmr.msra.gmra.mrb[12].mxu0 %vm196_vm2, %v809_v42 }
0x1308   :  { %2467 = vmatpush3.bf16.msra.mxu0 %v2464_v33  ;;  %2301 = vmatprep.mubr.msk.f32.mxu0 %vm196_vm2, %v2728_v36 }
0x1309   :  { %2469 = vmatprep.subr.bf16.mxu0 %v2468_v41 }
0x130c   :  { %2471 = vmatpush3.bf16.msra.mxu0 %v2468_v41 }
0x130d   :  { %2484 = vmatprep.subr.bf16.mxu0 %v2596_v0 }
0x130f   :  { %2302 = vmatmul.mubr.msk.f32.vlgmr.msra.gmra.mrb[14].mxu0 %vm196_vm2, %v2779_v7 }
0x1310   :  { %2304 = vmatprep.mubr.msk.f32.mxu0 %vm196_vm2, %v2796_v30  ;;  %2486 = vmatpush3.bf16.msra.mxu0 %v2892_v8 }
0x1311   :  { %2487 = vmatprep.subr.bf16.mxu0 %v2596_v0 }
0x1313   :  { %2305 = vmatmul.mubr.msk.f32.gmra.mrb[16].mxu0 %vm196_vm2, %v2813_v51 }
0x1314   :  { %2307 = vmatprep.mubr.msk.f32.mxu0 %vm196_vm2, %v707_v16  ;;  %2489 = vmatpush3.bf16.msra.mxu0 %v2902_v12 }
0x1315   :  { %2496 = vmatprep.subr.bf16.mxu0 %v2596_v0 }
0x1317   :  { %2308 = vmatmul.mubr.msk.f32.gmra.mrb[18].mxu0 %vm196_vm2, %v809_v42 }
0x13da   :  { %v878_v43 = vpop.f32.mrb[12].mxu0 }
0x13db   :  { %v879_v36 = vadd.f32 %v2714_v14, %v878_v43  ;;  %v2281_v44 = vpop.f32.mrb[13].mxu0 }
0x13dd   :  { %888 = vrot.lane.b32.xlu0 %v879_v36, %s2599_s14  ;;  %v882_v50 = vadd.f32 %v879_v36, %v177_v49 }
0x13df   :  { %v883_v51 = vmul.f32 0.5, %v882_v50 }
0x13e1   :  { %2556 = vtanh.f32 %v883_v51 }
0x13e2   :  { %v2871_v45 = vpop.f32.mrb[14].mxu0 }
0x13e3   :  { %v1093_v46 = vpop.f32.mrb[15].mxu0 }
0x13e4   :  { %v1094_v23 = vadd.f32 %v2935_v5, %v1093_v46 }
0x13e6   :  { %v2873_v7 = vpop.f32.mrb[16].mxu0 }
0x13e7   :  { %v2875_v47 = vpop.f32.mrb[17].mxu0 }
0x13ea   :  { %v2877_v30 = vpop.f32.mrb[18].mxu0 }
0x13eb   :  { %v2879_v48 = vpop.f32.mrb[19].mxu0  ;;  %v2557_v52 = vpop.eup %2556 }
0x13ec   :  { %v885_v53 = vadd.f32 1.0, %v2557_v52 }
0x13ee   :  { %v886_v54 = vmul.f32 0.5, %v885_v53 }
0x144f   :  { %v889_v55 = vpop.permute.xlu0 %888 }
0x1450   :  { %v891_v56 = vmul.f32 %v889_v55, %v886_v54 }
0x1452   :  { %893 = vrot.lane.b32.xlu1 %v891_v56, %s2599_s14 }
0x14c4   :  { %v894_v57 = vpop.permute.xlu1 %893 }
0x14c5   :  { %v896_v58 = vadd.f32 %v894_v57, %v177_v49 }
0x14c7   :  { %2558 = vtanh.f32 %v896_v58 }
0x14d1   :  { %v2559_v59 = vpop.eup %2558 }
0x14d2   :  { %v898_v60 = vsub.f32 %v806_v38, %v2559_v59  ;;  %v182_v38 = vadd.f32 %v2775_v3, %v2721_v19 }
0x14d4   :  { %900 = vrot.lane.b32.xlu0 %v898_v60, %s2600_s4 }
0x1546   :  { %v901_v61 = vpop.permute.xlu0 %900 }
0x1547   :  { %v903_v62 = vmul.f32 %v901_v61, %v886_v54 }
0x1549   :  { %905 = vrot.lane.b32.xlu1 %v903_v62, %s2601_s3 }
0x15bb   :  { %v906_v13 = vpop.permute.xlu1 %905 }
0x15bc   :  { %v2906_v2 = vadd.f32 %v2559_v59, %v906_v13  ;;  %v1099_v59 = vadd.f32 %v2871_v45, %v2935_v5 }
0x15be   :  { %910 = vrot.lane.b32.xlu0 %v2906_v2, %s2599_s14 }
0x1630   :  { %v911_v15 = vpop.permute.xlu0 %910 }
0x1631   :  { %2291 = vmatmul.mubr.msk.f32.vlgmr.msra.gmra.mrb[8].mxu1 %vm196_vm2, %v911_v15  ;;  %2310 = vmatprep.mubr.msk.f32.mxu0 %vm196_vm2, %v911_v15 }
0x1632   :  { %2474 = vmatpush3.bf16.msra.mxu1 %v2892_v8  ;;  %2321 = vmatprep.mubr.msk.f32.mxu1 %vm2597_vm1, %v2598_v4 }
0x1633   :  { %2475 = vmatprep.subr.bf16.mxu1 %v2596_v0 }
0x1636   :  { %2477 = vmatpush3.bf16.msra.mxu1 %v2902_v12 }
0x1637   :  { %2478 = vmatprep.subr.bf16.mxu1 %v2596_v0 }
0x1639   :  { %2322 = vmatmul.mubr.f32.vlgmr.msra.gmra.mrb[10].mxu1 %v2598_v4 }
0x163a   :  { %2480 = vmatpush3.bf16.msra.mxu1 %v2892_v8  ;;  %2332 = vmatprep.mubr.msk.f32.mxu1 %vm2597_vm1, %v2598_v4 }
0x163b   :  { %2481 = vmatprep.subr.bf16.mxu1 %v2596_v0 }
0x163e   :  { %2483 = vmatpush3.bf16.msra.mxu1 %v2902_v12 }
0x163f   :  { %2490 = vmatprep.subr.bf16.mxu1 %v2596_v0 }
0x1704   :  { %v980_v16 = vpop.f32.mrb[8].mxu1 }
0x1705   :  { %v2292_v17 = vpop.f32.mrb[9].mxu1  ;;  %v981_v37 = vadd.f32 %v2714_v14, %v980_v16 }
0x1707   :  { %v984_v39 = vadd.f32 %v981_v37, %v182_v38 }
0x1709   :  { %v985_v40 = vmul.f32 0.5, %v984_v39 }
0x170c   :  { %v1209_v20 = vpop.f32.mrb[10].mxu1 }
0x170d   :  { %v1210_v21 = vadd.f32 %v2928_v18, %v1209_v20  ;;  %v2323_v22 = vpop.f32.mrb[11].mxu1 }
0x170f   :  { %1219 = vrot.lane.b32.xlu1 %v1210_v21, %s2599_s14  ;;  %v1213_v24 = vadd.f32 %v1210_v21, %v1094_v23 }
0x1711   :  { %v1214_v25 = vmul.f32 0.5, %v1213_v24 }
0x1713   :  { %2560 = vtanh.f32 %v1214_v25 }
0x171d   :  { %v2561_v26 = vpop.eup %2560 }
0x171e   :  { %v1216_v27 = vadd.f32 1.0, %v2561_v26 }
0x1720   :  { %v1217_v11 = vmul.f32 0.5, %v1216_v27 }
0x1781   :  { %v1220_v28 = vpop.permute.xlu1 %1219 }
0x1782   :  { %v1222_v29 = vmul.f32 %v1220_v28, %v1217_v11  ;;  %v1104_v28 = vadd.f32 %v2935_v5, %v2875_v47 }
0x1784   :  { %1224 = vrot.lane.b32.xlu0 %v1222_v29, %s2599_s14 }
0x17f6   :  { %v1225_v31 = vpop.permute.xlu0 %1224 }
0x17f7   :  { %v1227_v1 = vadd.f32 %v1225_v31, %v1094_v23 }
0x17f9   :  { %2562 = vtanh.f32 %v1227_v1 }
0x17fa   :  { %2564 = vtanh.f32 %v985_v40 }
0x1803   :  { %v2563_v32 = vpop.eup %2562 }
0x1804   :  { %v1229_v33 = vsub.f32 0.0, %v2563_v32  ;;  %v2565_v41 = vpop.eup %2564 }
0x1805   :  { %v987_v42 = vadd.f32 1.0, %v2565_v41 }
0x1806   :  { %1231 = vrot.lane.b32.xlu1 %v1229_v33, %s2600_s4 }
0x1807   :  { %v988_v44 = vmul.f32 0.5, %v987_v42 }
0x1878   :  { %v1232_v34 = vpop.permute.xlu1 %1231 }
0x1879   :  { %v1234_v35 = vmul.f32 %v1232_v34, %v1217_v11 }
0x187b   :  { %1236 = vrot.lane.b32.xlu0 %v1234_v35, %s2601_s3 }
0x187f   :  { %990 = vrot.lane.b32.xlu0 %v981_v37, %s2599_s14 }
0x18ed   :  { %v1237_v43 = vpop.permute.xlu0 %1236 }
0x18ee   :  { %v1239_v36 = vadd.f32 %v2563_v32, %v1237_v43 }
0x18f0   :  { %1241 = vrot.lane.b32.xlu1 %v1239_v36, %s2599_s14 }
0x18f1   :  { %v991_v46 = vpop.permute.xlu0 %990 }
0x18f2   :  { %v993_v49 = vmul.f32 %v991_v46, %v988_v44 }
0x18f4   :  { %995 = vrot.lane.b32.xlu0 %v993_v49, %s2599_s14 }
0x1962   :  { %v1242_v14 = vpop.permute.xlu1 %1241 }
0x1963   :  { %2333 = vmatmul.mubr.msk.f32.vlgmr.msra.gmra.mrb[12].mxu1 %vm196_vm2, %v1242_v14  ;;  %v1109_v14 = vadd.f32 %v2873_v7, %v2935_v5 }
0x1964   :  { %2492 = vmatpush3.bf16.msra.mxu1 %v2892_v8  ;;  %2354 = vmatprep.mubr.msk.f32.mxu1 %vm2597_vm1, %v2598_v4 }
0x1965   :  { %2493 = vmatprep.subr.bf16.mxu1 %v2596_v0 }
0x1966   :  { %v996_v19 = vpop.permute.xlu0 %995 }
0x1967   :  { %v998_v3 = vadd.f32 %v996_v19, %v182_v38 }
0x1968   :  { %2495 = vmatpush3.bf16.msra.mxu1 %v2902_v12 }
0x1969   :  { %2566 = vtanh.f32 %v998_v3  ;;  %2502 = vmatprep.subr.bf16.mxu1 %v2596_v0 }
0x1973   :  { %v2567_v50 = vpop.eup %2566 }
0x1974   :  { %v1000_v51 = vsub.f32 %v2906_v2, %v2567_v50 }
0x1976   :  { %1002 = vrot.lane.b32.xlu0 %v1000_v51, %s2600_s4 }
0x19e8   :  { %v1003_v52 = vpop.permute.xlu0 %1002 }
0x19e9   :  { %v1005_v53 = vmul.f32 %v1003_v52, %v988_v44 }
0x19eb   :  { %1007 = vrot.lane.b32.xlu0 %v1005_v53, %s2601_s3 }
0x1a36   :  { %v1311_v54 = vpop.f32.mrb[12].mxu1 }
0x1a37   :  { %v1312_v55 = vadd.f32 %v2928_v18, %v1311_v54  ;;  %v2334_v56 = vpop.f32.mrb[13].mxu1 }
0x1a39   :  { %1321 = vrot.lane.b32.xlu1 %v1312_v55, %s2599_s14  ;;  %v1315_v60 = vadd.f32 %v1312_v55, %v1099_v59 }
0x1a3b   :  { %v1316_v61 = vmul.f32 0.5, %v1315_v60 }
0x1a3d   :  { %2568 = vtanh.f32 %v1316_v61 }
0x1a47   :  { %v2569_v62 = vpop.eup %2568 }
0x1a48   :  { %v1318_v6 = vadd.f32 1.0, %v2569_v62 }
0x1a4a   :  { %v1319_v63 = vmul.f32 0.5, %v1318_v6 }
0x1a5d   :  { %v1008_v57 = vpop.permute.xlu0 %1007 }
0x1a5e   :  { %v1010_v58 = vadd.f32 %v2567_v50, %v1008_v57 }
0x1a60   :  { %1023 = vrot.lane.b32.xlu0 %v1010_v58, %s2599_s14 }
0x1aab   :  { %v1322_v9 = vpop.permute.xlu1 %1321 }
0x1aac   :  { %v1324_v10 = vmul.f32 %v1322_v9, %v1319_v63 }
0x1aae   :  { %1326 = vrot.lane.b32.xlu1 %v1324_v10, %s2599_s14  ;;  %v1114_v10 = vadd.f32 %v2935_v5, %v2879_v48 }
0x1ad2   :  { %v1024_v13 = vpop.permute.xlu0 %1023 }
0x1ad3   :  { %2311 = vmatmul.mubr.msk.f32.gmra.mrb[20].mxu0 %vm196_vm2, %v1024_v13 }
0x1ad4   :  { %2343 = vmatprep.mubr.msk.f32.mxu0 %vm2597_vm1, %v2598_v4 }
0x1b20   :  { %v1327_v2 = vpop.permute.xlu1 %1326 }
0x1b21   :  { %v1329_v15 = vadd.f32 %v1327_v2, %v1099_v59 }
0x1b23   :  { %2570 = vtanh.f32 %v1329_v15 }
0x1b2d   :  { %v2571_v45 = vpop.eup %2570 }
0x1b2e   :  { %v1331_v16 = vsub.f32 %v1239_v36, %v2571_v45 }
0x1b30   :  { %1333 = vrot.lane.b32.xlu1 %v1331_v16, %s2600_s4 }
0x1ba2   :  { %v1334_v17 = vpop.permute.xlu1 %1333 }
0x1ba3   :  { %v1336_v20 = vmul.f32 %v1334_v17, %v1319_v63 }
0x1ba5   :  { %1338 = vrot.lane.b32.xlu1 %v1336_v20, %s2601_s3 }
0x1ba6   :  { %v2968_v21 = vpop.f32.mrb[20].mxu0 }
0x1ba7   :  { %v2970_v22 = vpop.f32.mrb[21].mxu0 }
0x1c17   :  { %v1339_v23 = vpop.permute.xlu1 %1338 }
0x1c18   :  { %v1341_v24 = vadd.f32 %v2571_v45, %v1339_v23 }
0x1c1a   :  { %1343 = vrot.lane.b32.xlu1 %v1341_v24, %s2599_s14 }
0x1c8c   :  { %v1344_v25 = vpop.permute.xlu1 %1343 }
0x1c8d   :  { %2344 = vmatmul.mubr.msk.f32.vlgmr.msra.gmra.mrb[22].mxu0 %vm196_vm2, %v1344_v25 }
0x1c8e   :  { %2498 = vmatpush3.bf16.msra.mxu0 %v2892_v8  ;;  %2365 = vmatprep.mubr.msk.f32.mxu0 %vm2597_vm1, %v2598_v4 }
0x1c8f   :  { %2499 = vmatprep.subr.bf16.mxu0 %v2596_v0 }
0x1c92   :  { %2501 = vmatpush3.bf16.msra.mxu0 %v2902_v12 }
0x1c93   :  { %2508 = vmatprep.subr.bf16.mxu0 %v2596_v0 }
0x1d60   :  { %v1413_v26 = vpop.f32.mrb[22].mxu0 }
0x1d61   :  { %v1414_v27 = vadd.f32 %v2928_v18, %v1413_v26  ;;  %v2345_v11 = vpop.f32.mrb[23].mxu0 }
0x1d63   :  { %1423 = vrot.lane.b32.xlu0 %v1414_v27, %s2599_s14  ;;  %v1417_v29 = vadd.f32 %v1414_v27, %v1104_v28 }
0x1d65   :  { %v1418_v31 = vmul.f32 0.5, %v1417_v29 }
0x1d67   :  { %2572 = vtanh.f32 %v1418_v31 }
0x1d71   :  { %v2573_v1 = vpop.eup %2572 }
0x1d72   :  { %v1420_v32 = vadd.f32 1.0, %v2573_v1 }
0x1d74   :  { %v1421_v33 = vmul.f32 0.5, %v1420_v32 }
0x1dd5   :  { %v1424_v34 = vpop.permute.xlu0 %1423 }
0x1dd6   :  { %v1426_v35 = vmul.f32 %v1424_v34, %v1421_v33 }
0x1dd8   :  { %1428 = vrot.lane.b32.xlu1 %v1426_v35, %s2599_s14 }
0x1e4a   :  { %v1429_v37 = vpop.permute.xlu1 %1428 }
0x1e4b   :  { %v1431_v38 = vadd.f32 %v1429_v37, %v1104_v28 }
0x1e4d   :  { %2574 = vtanh.f32 %v1431_v38 }
0x1e57   :  { %v2575_v39 = vpop.eup %2574 }
0x1e58   :  { %v1433_v40 = vsub.f32 %v1341_v24, %v2575_v39 }
0x1e5a   :  { %1435 = vrot.lane.b32.xlu0 %v1433_v40, %s2600_s4 }
0x1ecc   :  { %v1436_v41 = vpop.permute.xlu0 %1435 }
0x1ecd   :  { %v1438_v42 = vmul.f32 %v1436_v41, %v1421_v33  ;;  %v1119_v33 = vadd.f32 %v2877_v30, %v2935_v5 }
0x1ecf   :  { %1440 = vrot.lane.b32.xlu1 %v1438_v42, %s2601_s3 }
0x1f41   :  { %v1441_v47 = vpop.permute.xlu1 %1440 }
0x1f42   :  { %v1443_v43 = vadd.f32 %v2575_v39, %v1441_v47 }
0x1f44   :  { %1445 = vrot.lane.b32.xlu0 %v1443_v43, %s2599_s14 }
0x1fb6   :  { %v1446_v36 = vpop.permute.xlu0 %1445 }
0x1fb7   :  { %2355 = vmatmul.mubr.msk.f32.vlgmr.msra.gmra.mrb[14].mxu1 %vm196_vm2, %v1446_v36 }
0x1fb8   :  { %2504 = vmatpush3.bf16.msra.mxu1 %v2892_v8  ;;  %2376 = vmatprep.mubr.msk.f32.mxu1 %vm2597_vm1, %v2598_v4 }
0x1fb9   :  { %2505 = vmatprep.subr.bf16.mxu1 %v2596_v0 }
0x1fbc   :  { %2507 = vmatpush3.bf16.msra.mxu1 %v2902_v12 }
0x1fbd   :  { %2514 = vmatprep.subr.bf16.mxu1 %v2596_v0 }
0x208a   :  { %v1515_v44 = vpop.f32.mrb[14].mxu1 }
0x208b   :  { %v1516_v46 = vadd.f32 %v2928_v18, %v1515_v44  ;;  %v2356_v49 = vpop.f32.mrb[15].mxu1 }
0x208d   :  { %1525 = vrot.lane.b32.xlu1 %v1516_v46, %s2599_s14  ;;  %v1519_v19 = vadd.f32 %v1516_v46, %v1109_v14 }
0x208f   :  { %v1520_v3 = vmul.f32 0.5, %v1519_v19 }
0x2091   :  { %2576 = vtanh.f32 %v1520_v3  ;;  %v1124_v3 = vadd.f32 %v2935_v5, %v2970_v22 }
0x209b   :  { %v2577_v50 = vpop.eup %2576 }
0x209c   :  { %v1522_v51 = vadd.f32 1.0, %v2577_v50 }
0x209e   :  { %v1523_v52 = vmul.f32 0.5, %v1522_v51 }
0x20ff   :  { %v1526_v53 = vpop.permute.xlu1 %1525 }
0x2100   :  { %v1528_v54 = vmul.f32 %v1526_v53, %v1523_v52 }
0x2102   :  { %1530 = vrot.lane.b32.xlu0 %v1528_v54, %s2599_s14 }
0x2174   :  { %v1531_v55 = vpop.permute.xlu0 %1530 }
0x2175   :  { %v1533_v56 = vadd.f32 %v1531_v55, %v1109_v14 }
0x2177   :  { %2578 = vtanh.f32 %v1533_v56 }
0x2181   :  { %v2579_v57 = vpop.eup %2578 }
0x2182   :  { %v1535_v58 = vsub.f32 %v1443_v43, %v2579_v57 }
0x2184   :  { %1537 = vrot.lane.b32.xlu1 %v1535_v58, %s2600_s4 }
0x21f6   :  { %v1538_v59 = vpop.permute.xlu1 %1537 }
0x21f7   :  { %v1540_v60 = vmul.f32 %v1538_v59, %v1523_v52 }
0x21f9   :  { %1542 = vrot.lane.b32.xlu0 %v1540_v60, %s2601_s3 }
0x226b   :  { %v1543_v7 = vpop.permute.xlu0 %1542 }
0x226c   :  { %v1545_v61 = vadd.f32 %v2579_v57, %v1543_v7 }
0x226e   :  { %1547 = vrot.lane.b32.xlu1 %v1545_v61, %s2599_s14 }
0x22e0   :  { %v1548_v62 = vpop.permute.xlu1 %1547 }
0x22e1   :  { %2366 = vmatmul.mubr.msk.f32.vlgmr.msra.gmra.mrb[24].mxu0 %vm196_vm2, %v1548_v62 }
0x22e2   :  { %2510 = vmatpush3.bf16.msra.mxu0 %v2892_v8  ;;  %2387 = vmatprep.mubr.msk.f32.mxu0 %vm2597_vm1, %v2598_v4 }
0x22e3   :  { %2511 = vmatprep.subr.bf16.mxu0 %v2596_v0 }
0x22e6   :  { %2513 = vmatpush3.bf16.msra.mxu0 %v2902_v12 }
0x22e7   :  { %2520 = vmatprep.subr.bf16.mxu0 %v2596_v0 }
0x23b4   :  { %v1617_v6 = vpop.f32.mrb[24].mxu0 }
0x23b5   :  { %v1618_v63 = vadd.f32 %v2928_v18, %v1617_v6  ;;  %v2367_v9 = vpop.f32.mrb[25].mxu0 }
0x23b7   :  { %1627 = vrot.lane.b32.xlu0 %v1618_v63, %s2599_s14  ;;  %v1621_v13 = vadd.f32 %v1618_v63, %v1114_v10 }
0x23b9   :  { %v1622_v2 = vmul.f32 0.5, %v1621_v13 }
0x23bb   :  { %2580 = vtanh.f32 %v1622_v2 }
0x23c5   :  { %v2581_v15 = vpop.eup %2580 }
0x23c6   :  { %v1624_v45 = vadd.f32 1.0, %v2581_v15 }
0x23c8   :  { %v1625_v16 = vmul.f32 0.5, %v1624_v45 }
0x2429   :  { %v1628_v17 = vpop.permute.xlu0 %1627 }
0x242a   :  { %v1630_v20 = vmul.f32 %v1628_v17, %v1625_v16 }
0x242c   :  { %1632 = vrot.lane.b32.xlu1 %v1630_v20, %s2599_s14 }
0x249e   :  { %v1633_v23 = vpop.permute.xlu1 %1632 }
0x249f   :  { %v1635_v24 = vadd.f32 %v1633_v23, %v1114_v10  ;;  %v1129_v10 = vadd.f32 %v2968_v21, %v2935_v5  ;;  %v1954_v5 = vld [vmem:[%s3081_s9] sm:$0xff]  ;;  %v1955_v21 = vld [vmem:[%s3081_s9 + $0x8] sm:$0xff] }
0x24a1   :  { %2582 = vtanh.f32 %v1635_v24 }
0x24ab   :  { %v2583_v25 = vpop.eup %2582 }
0x24ac   :  { %v1637_v26 = vsub.f32 %v1545_v61, %v2583_v25 }
0x24ae   :  { %1639 = vrot.lane.b32.xlu0 %v1637_v26, %s2600_s4  ;;  %v1956_v26 = vld [vmem:[%s3081_s9 + $0x10] sm:$0xff] }
0x2520   :  { %v1640_v27 = vpop.permute.xlu0 %1639 }
0x2521   :  { %v1642_v11 = vmul.f32 %v1640_v27, %v1625_v16  ;;  %v2521_v27 = vpack.c.bf16 %v1955_v21, %v1954_v5 }
0x2523   :  { %1644 = vrot.lane.b32.xlu1 %v1642_v11, %s2601_s3  ;;  %v1957_v11 = vld [vmem:[%s3081_s9 + $0x18] sm:$0xff] }
0x2595   :  { %v1645_v48 = vpop.permute.xlu1 %1644 }
0x2596   :  { %v1647_v28 = vadd.f32 %v2583_v25, %v1645_v48  ;;  %v2524_v48 = vpack.c.bf16 %v1957_v11, %v1956_v26 }
0x2598   :  { %1649 = vrot.lane.b32.xlu0 %v1647_v28, %s2599_s14 }
0x260a   :  { %v1650_v29 = vpop.permute.xlu0 %1649 }
0x260b   :  { %2377 = vmatmul.mubr.msk.f32.vlgmr.msra.gmra.mrb[16].mxu1 %vm196_vm2, %v1650_v29 }
0x260c   :  { %2516 = vmatpush3.bf16.msra.mxu1 %v2892_v8  ;;  %2398 = vmatprep.mubr.msk.f32.mxu1 %vm2597_vm1, %v2598_v4 }
0x260d   :  { %2517 = vmatprep.subr.bf16.mxu1 %v2596_v0 }
0x2610   :  { %2519 = vmatpush3.bf16.msra.mxu1 %v2902_v12 }
0x26de   :  { %v1719_v31 = vpop.f32.mrb[16].mxu1 }
0x26df   :  { %v1720_v1 = vadd.f32 %v2928_v18, %v1719_v31  ;;  %v2378_v32 = vpop.f32.mrb[17].mxu1 }
0x26e1   :  { %1729 = vrot.lane.b32.xlu1 %v1720_v1, %s2599_s14  ;;  %v1723_v34 = vadd.f32 %v1720_v1, %v1119_v33 }
0x26e3   :  { %v1724_v35 = vmul.f32 0.5, %v1723_v34 }
0x26e5   :  { %2584 = vtanh.f32 %v1724_v35 }
0x26ef   :  { %v2585_v8 = vpop.eup %2584 }
0x26f0   :  { %v1726_v37 = vadd.f32 1.0, %v2585_v8 }
0x26f2   :  { %v1727_v38 = vmul.f32 0.5, %v1726_v37 }
0x2753   :  { %v1730_v39 = vpop.permute.xlu1 %1729 }
0x2754   :  { %v1732_v40 = vmul.f32 %v1730_v39, %v1727_v38 }
0x2756   :  { %1734 = vrot.lane.b32.xlu0 %v1732_v40, %s2599_s14 }
0x27c8   :  { %v1735_v12 = vpop.permute.xlu0 %1734 }
0x27c9   :  { %v1737_v41 = vadd.f32 %v1735_v12, %v1119_v33  ;;  %v2080_v33 = vld [vmem:[%s3082_s10] ss:$0 sm:$0xff] }
0x27cb   :  { %2586 = vtanh.f32 %v1737_v41 }
0x27d5   :  { %v2587_v42 = vpop.eup %2586 }
0x27d6   :  { %v1739_v47 = vsub.f32 %v1647_v28, %v2587_v42 }
0x27d8   :  { %1741 = vrot.lane.b32.xlu1 %v1739_v47, %s2600_s4 }
0x284a   :  { %v1742_v43 = vpop.permute.xlu1 %1741 }
0x284b   :  { %v1744_v36 = vmul.f32 %v1742_v43, %v1727_v38 }
0x284d   :  { %1746 = vrot.lane.b32.xlu0 %v1744_v36, %s2601_s3 }
0x28bf   :  { %v1747_v30 = vpop.permute.xlu0 %1746 }
0x28c0   :  { %v1749_v44 = vadd.f32 %v2587_v42, %v1747_v30 }
0x28c2   :  { %1751 = vrot.lane.b32.xlu1 %v1749_v44, %s2599_s14 }
0x2934   :  { %v1752_v46 = vpop.permute.xlu1 %1751 }
0x2935   :  { %2388 = vmatmul.mubr.msk.f32.vlgmr.msra.gmra.mrb[26].mxu0 %vm196_vm2, %v1752_v46 }
0x2936   :  { %2409 = vmatprep.mubr.msk.f32.mxu0 %vm2597_vm1, %v2598_v4  ;;  %2522 = vmatpush3.bf16.msra.mxu0 %v2521_v27 }
0x2937   :  { %2523 = vmatprep.subr.bf16.mxu0 %v2596_v0 }
0x293a   :  { %2525 = vmatpush3.bf16.msra.mxu0 %v2524_v48 }
0x2a08   :  { %v1821_v49 = vpop.f32.mrb[26].mxu0 }
0x2a09   :  { %v1822_v14 = vadd.f32 %v2928_v18, %v1821_v49  ;;  %v2389_v19 = vpop.f32.mrb[27].mxu0 }
0x2a0b   :  { %1831 = vrot.lane.b32.xlu0 %v1822_v14, %s2599_s14  ;;  %v1825_v50 = vadd.f32 %v1822_v14, %v1124_v3 }
0x2a0d   :  { %v1826_v51 = vmul.f32 0.5, %v1825_v50 }
0x2a0f   :  { %2588 = vtanh.f32 %v1826_v51 }
0x2a19   :  { %v2589_v52 = vpop.eup %2588 }
0x2a1a   :  { %v1828_v53 = vadd.f32 1.0, %v2589_v52 }
0x2a1c   :  { %v1829_v54 = vmul.f32 0.5, %v1828_v53 }
0x2a7d   :  { %v1832_v55 = vpop.permute.xlu0 %1831 }
0x2a7e   :  { %v1834_v56 = vmul.f32 %v1832_v55, %v1829_v54 }
0x2a80   :  { %1836 = vrot.lane.b32.xlu1 %v1834_v56, %s2599_s14 }
0x2af2   :  { %v1837_v4 = vpop.permute.xlu1 %1836 }
0x2af3   :  { %v1839_v57 = vadd.f32 %v1837_v4, %v1124_v3 }
0x2af5   :  { %2590 = vtanh.f32 %v1839_v57 }
0x2aff   :  { %v2591_v58 = vpop.eup %2590 }
0x2b00   :  { %v1841_v59 = vsub.f32 %v1749_v44, %v2591_v58 }
0x2b02   :  { %1843 = vrot.lane.b32.xlu0 %v1841_v59, %s2600_s4 }
0x2b74   :  { %v1844_v60 = vpop.permute.xlu0 %1843 }
0x2b75   :  { %v1846_v7 = vmul.f32 %v1844_v60, %v1829_v54 }
0x2b77   :  { %1848 = vrot.lane.b32.xlu1 %v1846_v7, %s2601_s3 }
0x2be9   :  { %v1849_v22 = vpop.permute.xlu1 %1848 }
0x2bea   :  { %v1851_v61 = vadd.f32 %v2591_v58, %v1849_v22 }
0x2bec   :  { %1853 = vrot.lane.b32.xlu0 %v1851_v61, %s2599_s14 }
0x2c5e   :  { %v1854_v62 = vpop.permute.xlu0 %1853 }
0x2c5f   :  { %2399 = vmatmul.mubr.msk.f32.vlgmr.msra.gmra.mrb[18].mxu1 %vm196_vm2, %v1854_v62 }
0x2d32   :  { %v1923_v6 = vpop.f32.mrb[18].mxu1 }
0x2d33   :  { %v1924_v63 = vadd.f32 %v2928_v18, %v1923_v6  ;;  %v2400_v9 = vpop.f32.mrb[19].mxu1 }
0x2d35   :  { %1933 = vrot.lane.b32.xlu1 %v1924_v63, %s2599_s14  ;;  %v1927_v13 = vadd.f32 %v1924_v63, %v1129_v10 }
0x2d37   :  { %v1928_v2 = vmul.f32 0.5, %v1927_v13 }
0x2d39   :  { %2592 = vtanh.f32 %v1928_v2 }
0x2d43   :  { %v2593_v15 = vpop.eup %2592 }
0x2d44   :  { %v1930_v45 = vadd.f32 1.0, %v2593_v15 }
0x2d46   :  { %v1931_v16 = vmul.f32 0.5, %v1930_v45 }
0x2da7   :  { %v1934_v17 = vpop.permute.xlu1 %1933 }
0x2da8   :  { %v1936_v20 = vmul.f32 %v1934_v17, %v1931_v16 }
0x2daa   :  { %1938 = vrot.lane.b32.xlu0 %v1936_v20, %s2599_s14 }
0x2e1c   :  { %v1939_v23 = vpop.permute.xlu0 %1938 }
0x2e1d   :  { %v1941_v24 = vadd.f32 %v1939_v23, %v1129_v10 }
0x2e1f   :  { %2594 = vtanh.f32 %v1941_v24 }
0x2e29   :  { %v2595_v18 = vpop.eup %2594 }
0x2e2a   :  { %v1943_v25 = vsub.f32 %v1851_v61, %v2595_v18 }
0x2e2c   :  { %1945 = vrot.lane.b32.xlu1 %v1943_v25, %s2600_s4 }
0x2e9e   :  { %v1946_v28 = vpop.permute.xlu1 %1945 }
0x2e9f   :  { %v1948_v29 = vmul.f32 %v1946_v28, %v1931_v16 }
0x2ea1   :  { %1950 = vrot.lane.b32.xlu0 %v1948_v29, %s2601_s3 }
0x2f13   :  { %v1951_v31 = vpop.permute.xlu0 %1950 }
0x2f14   :  { %v1953_v1 = vadd.f32 %v2595_v18, %v1951_v31 }
0x2f16   :  { %1966 = vrot.lane.b32.xlu1 %v1953_v1, %s2599_s14 }
0x2f88   :  { %v1967_v32 = vpop.permute.xlu1 %1966 }
0x2f89   :  { %2410 = vmatmul.mubr.msk.f32.vlgmr.msra.gmra.mrb[28].mxu0 %vm196_vm2, %v1967_v32 }
0x305c   :  { %v2036_v34 = vpop.f32.mrb[28].mxu0 }
0x305d   :  { %v2037_v35 = vadd.f32 %v2080_v33, %v2036_v34  ;;  %v2411_v0 = vpop.f32.mrb[29].mxu0 }
0x305f   :  { %2041 = vst.msk [vmem:[%s3083_s11] sm:$0xff] %vm2040_vm3, %v2037_v35 }

</bundles_post_ra>
